<compile_context>
chip_gen: v6e
topology: v6e:2x2x1
jax: 0.10.0
libtpu: 0.0.40
codegen_flags: <defaults>
</compile_context>

<pallas_src>
import functools

import jax
import jax.numpy as jnp
from jax.experimental import pallas as pl
from jax.experimental.pallas import tpu as pltpu


# ----------------------------------------------------------------------------
# Kernel
# ----------------------------------------------------------------------------
def _fused_kernel(x_ref, w1_ref, w2_ref, b2_ref, w3_ref, b3_ref, o_ref,
                  *, ts, halo, s_valid, compute_dtype):
    # x_ref : (R1p, S_pad + 2H) phase-stacked layer-1 input (+halo rows +ones row)
    # w1_ref: (128, R1p)   w2_ref: (128, 96)   w3_ref: (128, 128)
    # b2_ref/b3_ref: (128, 1) f32 stacked biases,  o_ref: (64, TS)
    t = pl.program_id(1)
    w = ts + 2 * halo

    if ts + 2 * halo == x_ref.shape[-1]:          # single time tile: static full load
        xw = x_ref[...]
    else:                                          # TS % 128 == 0 -> aligned window
        start = pl.multiple_of(t * ts, 128)
        xw = x_ref[:, pl.ds(start, w)]

    # ---- Layer 1: Conv1d(Cin->16) (+bias folded via ones-row), ReLU, pool ----
    y = jnp.dot(w1_ref[...], xw, preferred_element_type=jnp.float32)      # (128, W)
    a = jnp.maximum(jnp.maximum(y[:64], y[64:]), 0.0)                     # (64, W)

    # ---- Layer 2: block-banded conv as one (128,96)x(96,W-2) matmul ----------
    # +-1 time shifts = static lane-offset slices (window shrinks by 1/side).
    ext = jnp.concatenate(
        [a[48:64, 0:w - 2],      # left neighbour  (last pool phase @ s-1)
         a[:, 1:w - 1],          # centre
         a[0:16, 2:w]],          # right neighbour (first pool phase @ s+1)
        axis=0).astype(compute_dtype)                                     # (96, W-2)
    y = jnp.dot(w2_ref[...], ext, preferred_element_type=jnp.float32) + b2_ref[...]
    a = jnp.maximum(jnp.maximum(y[:64], y[64:]), 0.0)                     # (64, W-2)

    # Conv1d zero padding at the sequence ends: zero columns outside [0, S).
    gcol = jax.lax.broadcasted_iota(jnp.int32, (1, w - 2), 1) + (t * ts - halo + 1)
    a = jnp.where((gcol >= 0) & (gcol < s_valid), a, 0.0)

    # ---- Layer 3: (128,128)x(128,W-4) matmul ---------------------------------
    ext = jnp.concatenate(
        [a[32:64, 0:w - 4],
         a[:, 1:w - 3],
         a[0:32, 2:w - 2]],
        axis=0).astype(compute_dtype)                                     # (128, W-4)
    y = jnp.dot(w3_ref[...], ext, preferred_element_type=jnp.float32) + b3_ref[...]
    a = jnp.maximum(jnp.maximum(y[:64], y[64:]), 0.0)                     # (64, W-4)

    # Keep the TS centre columns (discard the halo region) and store.
    o_ref[...] = a[:, halo - 2:halo - 2 + ts].astype(o_ref.dtype)


# ----------------------------------------------------------------------------
# Wrapper-side layout plumbing (free: runs once in plain JAX)
# ----------------------------------------------------------------------------
def _block_banded_weight(w):
    """w: (Cout, Cin, 3) Conv1d kernel; P = 128 // Cout phases.

    Returns a (128, (P+2)*Cin) block-tridiagonal matrix whose output phases are
    ordered even-first, so MaxPool1d(2,2) == max of the top/bottom 64-row halves
    and the pooled result is already stacked in natural phase order."""
    cout, cin, _ = w.shape
    p_phases = 128 // cout
    big = jnp.zeros((p_phases * cout, (p_phases + 2) * cin), jnp.float32)
    for p in range(p_phases):
        blk = (p // 2) if p % 2 == 0 else (p_phases // 2 + p // 2)
        r = blk * cout
        for tap in range(3):
            c = (p + tap) * cin
            big = big.at[r:r + cout, c:c + cin].set(w[:, :, tap].astype(jnp.float32))
    return big


def audio_feature_extractor(x, params, *, time_tile=512, matmul_dtype=None):
    """x: (B, Cin, L) with L % 8 == 0.  params = (w1,b1,w2,b2,w3,b3) in PyTorch
    Conv1d layout ((Cout,Cin,3)/(Cout,)).  Returns (B, 64 * (L // 8)), matching
    AudioFeatureExtractor.forward.  matmul_dtype=jnp.bfloat16 enables bf16 MXU
    operands (f32 accumulation) for v6e/v7x."""
    w1, b1, w2, b2, w3, b3 = params
    B, Cin, L = x.shape
    if L % 8 != 0 or L < 16:
        raise ValueError(f"sequence length {L} must be a multiple of 8 (>= 16)")
    S = L // 8
    H = 4                                            # halo columns per side (>= 2 needed)
    cd = jnp.float32 if matmul_dtype is None else matmul_dtype

    # ---- time tiling --------------------------------------------------------
    if S <= time_tile:
        ts, n_tiles = S, 1
    else:
        ts = int(time_tile)
        if ts % 128 != 0:
            raise ValueError("time_tile must be a multiple of 128")
        n_tiles = pl.cdiv(S, ts)
    s_pad = ts * n_tiles

    # ---- layer-1 polyphase input + halo rows + folded-bias ones row ---------
    xf = x.astype(jnp.float32)
    xp = xf.reshape(B, Cin, S, 8).transpose(0, 3, 1, 2)              # (B, 8, Cin, S)
    lhalo = jnp.pad(xp[:, 7], ((0, 0), (0, 0), (1, 0)))[:, :, :S]    # phase 7 @ s-1
    rhalo = jnp.pad(xp[:, 0], ((0, 0), (0, 0), (0, 1)))[:, :, 1:]    # phase 0 @ s+1
    ones = jnp.ones((B, 1, S), jnp.float32)                          # folded-bias row
    r1 = 10 * Cin + 1
    r1p = ((r1 + 7) // 8) * 8                                        # round K to sublane tile
    xext = jnp.concatenate(
        [lhalo, xp.reshape(B, 8 * Cin, S), rhalo, ones,
         jnp.zeros((B, r1p - r1, S), jnp.float32)], axis=1)          # (B, r1p, S)
    # Zero-pad the time axis: H columns left, H + (s_pad - S) right.  The zero
    # pad (incl. the ones-row) makes layer-1 output exactly zero outside [0,S).
    xext = jnp.pad(xext, ((0, 0), (0, 0), (H, H + s_pad - S))).astype(cd)
    s_in = s_pad + 2 * H

    # ---- block-banded weights ------------------------------------------------
    w1b = _block_banded_weight(w1)                                   # (128, 10*Cin)
    w1b = jnp.concatenate(
        [w1b, jnp.tile(b1.astype(jnp.float32), 8).reshape(128, 1),   # fold layer-1 bias
         jnp.zeros((128, r1p - r1), jnp.float32)], axis=1).astype(cd)  # (128, r1p)
    w2b = _block_banded_weight(w2).astype(cd)                        # (128, 96)
    w3b = _block_banded_weight(w3).astype(cd)                        # (128, 128)
    b2s = jnp.tile(b2.astype(jnp.float32), 4).reshape(128, 1)
    b3s = jnp.tile(b3.astype(jnp.float32), 2).reshape(128, 1)

    kernel = functools.partial(_fused_kernel, ts=ts, halo=H, s_valid=S,
                               compute_dtype=cd)

    out = pl.pallas_call(
        kernel,
        out_shape=jax.ShapeDtypeStruct((B, 64, s_pad), x.dtype),
        grid_spec=pltpu.PrefetchScalarGridSpec(
            num_scalar_prefetch=0,
            grid=(B, n_tiles),
            in_specs=[
                # Tiny phase-stacked input, resident per batch element
                # (index map constant in t => one DMA per batch element).
                pl.BlockSpec((pl.Squeezed(), r1p, s_in), lambda b, t: (b, 0, 0)),
                # Weights / biases: constant index maps => VMEM-resident.
                pl.BlockSpec(w1b.shape, lambda b, t: (0, 0)),
                pl.BlockSpec(w2b.shape, lambda b, t: (0, 0)),
                pl.BlockSpec(b2s.shape, lambda b, t: (0, 0)),
                pl.BlockSpec(w3b.shape, lambda b, t: (0, 0)),
                pl.BlockSpec(b3s.shape, lambda b, t: (0, 0)),
            ],
            out_specs=pl.BlockSpec((pl.Squeezed(), 64, ts), lambda b, t: (b, 0, t)),
        ),
        compiler_params=pltpu.CompilerParams(
            dimension_semantics=("parallel", "parallel"),   # shard B and time tiles (v7x)
            vmem_limit_bytes=32 * 1024 * 1024,              # headroom above v5e's 16 MiB default
        ),
    )(xext, w1b, w2b, b2s, w3b, b3s)

    out = out[:, :, :S] if s_pad != S else out
    # PyTorch `.view(-1, feature_dim)` flatten (channel-major) — free reshape.
    return out.reshape(B, 64 * S)


# ----------------------------------------------------------------------------
# Pure-JAX reference (correctness check only)
# ----------------------------------------------------------------------------
def _reference(x, params):
    w1, b1, w2, b2, w3, b3 = params

    def layer(h, w, b):
        y = jax.lax.conv_general_dilated(
            h, w, window_strides=(1,), padding=((1, 1),),
            dimension_numbers=("NCH", "OIH", "NCH"),
            precision=jax.lax.Precision.HIGHEST)
        y = jnp.maximum(y + b[None, :, None], 0.0)
        Bb, C, Ll = y.shape
        return y.reshape(Bb, C, Ll // 2, 2).max(axis=-1)

    h = layer(x, w1, b1)
    h = layer(h, w2, b2)
    h = layer(h, w3, b3)
    return h.reshape(h.shape[0], -1)


if __name__ == "__main__":
    B, Cin, L = 2, 1, 2048           # small test shapes (real module: L = 16000)
    key = jax.random.PRNGKey(0)
    ks = jax.random.split(key, 7)
    x = jax.random.normal(ks[0], (B, Cin, L), dtype=jnp.float32)
    params = (
        0.30 * jax.random.normal(ks[1], (16, Cin, 3), dtype=jnp.float32),
        0.10 * jax.random.normal(ks[2], (16,), dtype=jnp.float32),
        0.15 * jax.random.normal(ks[3], (32, 16, 3), dtype=jnp.float32),
        0.10 * jax.random.normal(ks[4], (32,), dtype=jnp.float32),
        0.10 * jax.random.normal(ks[5], (64, 32, 3), dtype=jnp.float32),
        0.10 * jax.random.normal(ks[6], (64,), dtype=jnp.float32),
    )

    # f32 MXU operands, multi-tile time grid (S=256 -> two 128-wide tiles).
    run = jax.jit(functools.partial(audio_feature_extractor, time_tile=128))
    out = jax.block_until_ready(run(x, params))
    ref = jax.block_until_ready(_reference(x, params))
    assert out.shape == (B, 64 * (L // 8)), out.shape
    err = float(jnp.max(jnp.abs(out - ref)))
    assert jnp.allclose(out, ref, atol=1e-2, rtol=1e-2), f"max |err| = {err}"

    # Ragged length: S=200 gets padded up to two 128-wide tiles, then un-padded.
    x2 = x[:1, :, :1600]
    out2 = jax.block_until_ready(
        jax.jit(functools.partial(audio_feature_extractor, time_tile=128))(x2, params))
    ref2 = _reference(x2, params)
    err2 = float(jnp.max(jnp.abs(out2 - ref2)))
    assert out2.shape == (1, 64 * 200), out2.shape
    assert jnp.allclose(out2, ref2, atol=1e-2, rtol=1e-2), f"max |err| = {err2}"

    # bf16 MXU operands (native rate on v6e/v7x), f32 accumulation.
    out_bf = jax.block_until_ready(
        jax.jit(functools.partial(audio_feature_extractor, time_tile=128,
                                  matmul_dtype=jnp.bfloat16))(x, params))
    err_bf = float(jnp.max(jnp.abs(out_bf - ref)))
    assert jnp.allclose(out_bf, ref, atol=1e-1, rtol=1e-1), f"max |err| = {err_bf}"

    print("KERNEL_OK")
</pallas_src>

<mosaic_0001>
module attributes {stable_mosaic.version = 11 : i64} {
  func.func @_fused_kernel(%arg0: i32, %arg1: i32, %arg2: memref<1x16x264xf32, #tpu.memory_space<vmem>>, %arg3: memref<128x16xf32, #tpu.memory_space<vmem>>, %arg4: memref<128x96xf32, #tpu.memory_space<vmem>>, %arg5: memref<128x1xf32, #tpu.memory_space<vmem>>, %arg6: memref<128x128xf32, #tpu.memory_space<vmem>>, %arg7: memref<128x1xf32, #tpu.memory_space<vmem>>, %arg8: memref<1x64x128xf32, #tpu.memory_space<vmem>>) attributes {dimension_semantics = [#tpu.dimension_semantics<parallel>, #tpu.dimension_semantics<parallel>], iteration_bounds = array<i64: 2, 2>, scalar_prefetch = 0 : i64, scratch_operands = 0 : i64, tpu.core_type = #tpu.core_type<tc>, window_params = [{transform_indices = @transform_0, window_bounds = array<i64: 1, 16, 264>}, {pipeline_mode = #tpu.pipeline_mode<synchronous>, transform_indices = @transform_1, window_bounds = array<i64: 128, 16>}, {pipeline_mode = #tpu.pipeline_mode<synchronous>, transform_indices = @transform_2, window_bounds = array<i64: 128, 96>}, {pipeline_mode = #tpu.pipeline_mode<synchronous>, transform_indices = @transform_3, window_bounds = array<i64: 128, 1>}, {pipeline_mode = #tpu.pipeline_mode<synchronous>, transform_indices = @transform_4, window_bounds = array<i64: 128, 128>}, {pipeline_mode = #tpu.pipeline_mode<synchronous>, transform_indices = @transform_5, window_bounds = array<i64: 128, 1>}, {transform_indices = @transform_6, window_bounds = array<i64: 1, 64, 128>}]} {
    %c128_i32 = arith.constant 128 : i32
    %0 = arith.muli %arg1, %c128_i32 : i32
    %1 = tpu.assume_multiple %0, 128 : i32
    %c0 = arith.constant 0 : index
    %c0_0 = arith.constant 0 : index
    %2 = arith.index_cast %1 : i32 to index
    %3 = vector.load %arg2[%c0, %c0_0, %2] : memref<1x16x264xf32, #tpu.memory_space<vmem>>, vector<1x16x136xf32>
    %4 = vector.shape_cast %3 : vector<1x16x136xf32> to vector<16x136xf32>
    %c0_1 = arith.constant 0 : index
    %c0_2 = arith.constant 0 : index
    %5 = vector.load %arg3[%c0_1, %c0_2] : memref<128x16xf32, #tpu.memory_space<vmem>>, vector<128x16xf32>
    %cst = arith.constant dense<0.000000e+00> : vector<128x136xf32>
    %6 = tpu.matmul %5, %4, %cst {dimension_numbers = #tpu.dot_dimension_numbers<[1], [0], [0], [1], [0, 0, 1, 1], [], []>} : vector<128x16xf32>, vector<16x136xf32>, vector<128x136xf32> -> vector<128x136xf32>
    %7 = vector.extract_strided_slice %6 {offsets = [0, 0], sizes = [64, 136], strides = [1, 1]} : vector<128x136xf32> to vector<64x136xf32>
    %8 = vector.extract_strided_slice %6 {offsets = [64, 0], sizes = [64, 136], strides = [1, 1]} : vector<128x136xf32> to vector<64x136xf32>
    %9 = arith.maximumf %7, %8 : vector<64x136xf32>
    %cst_3 = arith.constant 0.000000e+00 : f32
    %10 = vector.broadcast %cst_3 : f32 to vector<64x136xf32>
    %11 = arith.maximumf %9, %10 : vector<64x136xf32>
    %12 = vector.extract_strided_slice %11 {offsets = [48, 0], sizes = [16, 134], strides = [1, 1]} : vector<64x136xf32> to vector<16x134xf32>
    %13 = vector.extract_strided_slice %11 {offsets = [0, 1], sizes = [64, 134], strides = [1, 1]} : vector<64x136xf32> to vector<64x134xf32>
    %14 = vector.extract_strided_slice %11 {offsets = [0, 2], sizes = [16, 134], strides = [1, 1]} : vector<64x136xf32> to vector<16x134xf32>
    %15 = tpu.concatenate %12, %13, %14 in 0 : vector<16x134xf32>, vector<64x134xf32>, vector<16x134xf32> -> vector<96x134xf32>
    %c0_4 = arith.constant 0 : index
    %c0_5 = arith.constant 0 : index
    %16 = vector.load %arg4[%c0_4, %c0_5] : memref<128x96xf32, #tpu.memory_space<vmem>>, vector<128x96xf32>
    %cst_6 = arith.constant dense<0.000000e+00> : vector<128x134xf32>
    %17 = tpu.matmul %16, %15, %cst_6 {dimension_numbers = #tpu.dot_dimension_numbers<[1], [0], [0], [1], [0, 0, 1, 1], [], []>} : vector<128x96xf32>, vector<96x134xf32>, vector<128x134xf32> -> vector<128x134xf32>
    %c0_7 = arith.constant 0 : index
    %c0_8 = arith.constant 0 : index
    %18 = vector.load %arg5[%c0_7, %c0_8] : memref<128x1xf32, #tpu.memory_space<vmem>>, vector<128x1xf32>
    %19 = vector.broadcast %18 : vector<128x1xf32> to vector<128x134xf32>
    %20 = arith.addf %17, %19 : vector<128x134xf32>
    %21 = vector.extract_strided_slice %20 {offsets = [0, 0], sizes = [64, 134], strides = [1, 1]} : vector<128x134xf32> to vector<64x134xf32>
    %22 = vector.extract_strided_slice %20 {offsets = [64, 0], sizes = [64, 134], strides = [1, 1]} : vector<128x134xf32> to vector<64x134xf32>
    %23 = arith.maximumf %21, %22 : vector<64x134xf32>
    %cst_9 = arith.constant 0.000000e+00 : f32
    %24 = vector.broadcast %cst_9 : f32 to vector<64x134xf32>
    %25 = arith.maximumf %23, %24 : vector<64x134xf32>
    %26 = tpu.iota {dimensions = array<i32: 1>} : vector<1x134xi32>
    %c128_i32_10 = arith.constant 128 : i32
    %27 = arith.muli %arg1, %c128_i32_10 : i32
    %c4_i32 = arith.constant 4 : i32
    %28 = arith.subi %27, %c4_i32 : i32
    %c1_i32 = arith.constant 1 : i32
    %29 = arith.addi %28, %c1_i32 : i32
    %30 = vector.broadcast %29 : i32 to vector<1x134xi32>
    %31 = arith.addi %26, %30 : vector<1x134xi32>
    %c0_i32 = arith.constant 0 : i32
    %32 = vector.broadcast %c0_i32 : i32 to vector<1x134xi32>
    %33 = arith.cmpi sge, %31, %32 : vector<1x134xi32>
    %c256_i32 = arith.constant 256 : i32
    %34 = vector.broadcast %c256_i32 : i32 to vector<1x134xi32>
    %35 = arith.cmpi slt, %31, %34 : vector<1x134xi32>
    %36 = arith.andi %33, %35 : vector<1x134xi1>
    %cst_11 = arith.constant 0.000000e+00 : f32
    %37 = vector.shape_cast %36 : vector<1x134xi1> to vector<1x134xi1>
    %38 = vector.broadcast %37 : vector<1x134xi1> to vector<64x134xi1>
    %39 = vector.broadcast %cst_11 : f32 to vector<64x134xf32>
    %40 = arith.select %38, %25, %39 : vector<64x134xi1>, vector<64x134xf32>
    %41 = vector.extract_strided_slice %40 {offsets = [32, 0], sizes = [32, 132], strides = [1, 1]} : vector<64x134xf32> to vector<32x132xf32>
    %42 = vector.extract_strided_slice %40 {offsets = [0, 1], sizes = [64, 132], strides = [1, 1]} : vector<64x134xf32> to vector<64x132xf32>
    %43 = vector.extract_strided_slice %40 {offsets = [0, 2], sizes = [32, 132], strides = [1, 1]} : vector<64x134xf32> to vector<32x132xf32>
    %44 = tpu.concatenate %41, %42, %43 in 0 : vector<32x132xf32>, vector<64x132xf32>, vector<32x132xf32> -> vector<128x132xf32>
    %c0_12 = arith.constant 0 : index
    %c0_13 = arith.constant 0 : index
    %45 = vector.load %arg6[%c0_12, %c0_13] : memref<128x128xf32, #tpu.memory_space<vmem>>, vector<128x128xf32>
    %cst_14 = arith.constant dense<0.000000e+00> : vector<128x132xf32>
    %46 = tpu.matmul %45, %44, %cst_14 {dimension_numbers = #tpu.dot_dimension_numbers<[1], [0], [0], [1], [0, 0, 1, 1], [], []>} : vector<128x128xf32>, vector<128x132xf32>, vector<128x132xf32> -> vector<128x132xf32>
    %c0_15 = arith.constant 0 : index
    %c0_16 = arith.constant 0 : index
    %47 = vector.load %arg7[%c0_15, %c0_16] : memref<128x1xf32, #tpu.memory_space<vmem>>, vector<128x1xf32>
    %48 = vector.broadcast %47 : vector<128x1xf32> to vector<128x132xf32>
    %49 = arith.addf %46, %48 : vector<128x132xf32>
    %50 = vector.extract_strided_slice %49 {offsets = [0, 0], sizes = [64, 132], strides = [1, 1]} : vector<128x132xf32> to vector<64x132xf32>
    %51 = vector.extract_strided_slice %49 {offsets = [64, 0], sizes = [64, 132], strides = [1, 1]} : vector<128x132xf32> to vector<64x132xf32>
    %52 = arith.maximumf %50, %51 : vector<64x132xf32>
    %cst_17 = arith.constant 0.000000e+00 : f32
    %53 = vector.broadcast %cst_17 : f32 to vector<64x132xf32>
    %54 = arith.maximumf %52, %53 : vector<64x132xf32>
    %55 = vector.extract_strided_slice %54 {offsets = [0, 2], sizes = [64, 128], strides = [1, 1]} : vector<64x132xf32> to vector<64x128xf32>
    %c0_18 = arith.constant 0 : index
    %c0_19 = arith.constant 0 : index
    %c0_20 = arith.constant 0 : index
    %56 = vector.load %arg8[%c0_18, %c0_19, %c0_20] : memref<1x64x128xf32, #tpu.memory_space<vmem>>, vector<1x64x128xf32>
    %57 = vector.shape_cast %56 : vector<1x64x128xf32> to vector<64x128xf32>
    %58 = vector.shape_cast %55 : vector<64x128xf32> to vector<1x64x128xf32>
    tpu.vector_store %arg8[%c0_18, %c0_19, %c0_20], %58 {strides = array<i32>} : memref<1x64x128xf32, #tpu.memory_space<vmem>>, vector<1x64x128xf32>,
    return
  }
  func.func @transform_0(%arg0: i32, %arg1: i32) -> (i32, i32, i32) {
    %c0_i32 = arith.constant 0 : i32
    %c0_i32_0 = arith.constant 0 : i32
    %c0_i32_1 = arith.constant 0 : i32
    return %arg0, %c0_i32, %c0_i32_0 : i32, i32, i32
  }
  func.func @transform_1(%arg0: i32, %arg1: i32) -> (i32, i32) {
    %c0_i32 = arith.constant 0 : i32
    %c0_i32_0 = arith.constant 0 : i32
    %c0_i32_1 = arith.constant 0 : i32
    return %c0_i32, %c0_i32_0 : i32, i32
  }
  func.func @transform_2(%arg0: i32, %arg1: i32) -> (i32, i32) {
    %c0_i32 = arith.constant 0 : i32
    %c0_i32_0 = arith.constant 0 : i32
    %c0_i32_1 = arith.constant 0 : i32
    return %c0_i32, %c0_i32_0 : i32, i32
  }
  func.func @transform_3(%arg0: i32, %arg1: i32) -> (i32, i32) {
    %c0_i32 = arith.constant 0 : i32
    %c0_i32_0 = arith.constant 0 : i32
    %c0_i32_1 = arith.constant 0 : i32
    return %c0_i32, %c0_i32_0 : i32, i32
  }
  func.func @transform_4(%arg0: i32, %arg1: i32) -> (i32, i32) {
    %c0_i32 = arith.constant 0 : i32
    %c0_i32_0 = arith.constant 0 : i32
    %c0_i32_1 = arith.constant 0 : i32
    return %c0_i32, %c0_i32_0 : i32, i32
  }
  func.func @transform_5(%arg0: i32, %arg1: i32) -> (i32, i32) {
    %c0_i32 = arith.constant 0 : i32
    %c0_i32_0 = arith.constant 0 : i32
    %c0_i32_1 = arith.constant 0 : i32
    return %c0_i32, %c0_i32_0 : i32, i32
  }
  func.func @transform_6(%arg0: i32, %arg1: i32) -> (i32, i32, i32) {
    %c0_i32 = arith.constant 0 : i32
    %c0_i32_0 = arith.constant 0 : i32
    return %arg0, %c0_i32, %arg1 : i32, i32, i32
  }
}

</mosaic_0001>

<bundles_post_ra>
// kernel: tile.18
= control target key start
LH: loop header
LB: loop body
LE: loop exit
PB: predicated region body
PF: predicated region fallthrough
CT: control target
= control target key end

     0   :  { %s22_s0 = inlined_call_operand.vmem [shape: f32[16], index: 0, kind: input, shape index: {}]   ;;  %s23_s1 = inlined_call_operand.vmem [shape: f32[8,16], index: 1, kind: output, shape index: {}]  }
   0x1   :  { %v4_v0 = vld [vmem:[%s22_s0] ss:$0 sm:$0xff] }
   0x2   :  { %5 = vst [vmem:[%s23_s1] sm:$0xff] %v4_v0 }

// kernel: tile.19
= control target key start
LH: loop header
LB: loop body
LE: loop exit
PB: predicated region body
PF: predicated region fallthrough
CT: control target
= control target key end

     0   :  { %s69_s10 = smov 112   ;;  %s70_s11 = smov 80   ;;  %vm3_vm0 = vcmask 130048   ;;  %vm9_vm1 = vcmask 1048448   ;;  %vm15_vm2 = vcmask 917248   ;;  %vm21_vm3 = vcmask 786048   ;;  %s113_s0 = inlined_call_operand.vmem [shape: f32[8,16], index: 0, kind: input, shape index: {}]   ;;  %s114_s1 = inlined_call_operand.vmem [shape: f32[128,1], index: 1, kind: output, shape index: {}]  }
   0x1   :  { %v55_v0 = vld [vmem:[%s113_s0 + $0x7] sm:$0x1]   ;;  %v57_v1 = vld [vmem:[%s113_s0 + $0x5] sm:$0x1]   ;;  %v56_v2 = vld [vmem:[%s113_s0 + $0x6] sm:$0x1]  }
   0x2   :  { %7 = vrot.lane.b32.xlu0 %v55_v0, %s69_s10  ;;  %19 = vrot.lane.b32.xlu1 %v57_v1, %s70_s11  ;;  %v58_v3 = vld [vmem:[%s113_s0 + $0x4] sm:$0x1]   ;;  %v2_v4 = vld [vmem:[%s113_s0] sm:$0x1]   ;;  %s71_s18 = smov 96   ;;  %s72_s19 = smov 64  }
   0x3   :  { %4 = vst.msk [vmem:[#allocation0] sm:$0x1] %vm3_vm0, %v2_v4   ;;  %v59_v5 = vld [vmem:[%s113_s0 + $0x3] sm:$0x1]   ;;  %v60_v6 = vld [vmem:[%s113_s0 + $0x2] sm:$0x1]  }
   0x4   :  { %s73_s24 = smov 48   ;;  %s74_s25 = smov 32   ;;  %v61_v7 = vld [vmem:[%s113_s0 + $0x1] sm:$0x1]   ;;  %vm27_vm4 = vcmask 654848   ;;  %vm33_vm5 = vcmask 523648  }
   0x5   :  { %s75_s0 = smov 16   ;;  %vm39_vm6 = vcmask 392448   ;;  %vm45_vm7 = vcmask 261248  }
   0x6   :  { %13 = vrot.lane.b32.xlu0 %v56_v2, %s71_s18  ;;  %25 = vrot.lane.b32.xlu1 %v58_v3, %s72_s19 }
   0xa   :  { %31 = vrot.lane.b32.xlu0 %v59_v5, %s73_s24  ;;  %37 = vrot.lane.b32.xlu1 %v60_v6, %s74_s25 }
   0xe   :  { %43 = vrot.lane.b32.xlu0 %v61_v7, %s75_s0 }
  0x74   :  { %v8_v8 = vpop.permute.xlu0 %7   ;;  %v20_v9 = vpop.permute.xlu1 %19  }
  0x75   :  { %10 = vst.msk [vmem:[#allocation0] sm:$0x1] %vm9_vm1, %v8_v8  }
  0x78   :  { %v14_v10 = vpop.permute.xlu0 %13   ;;  %v26_v11 = vpop.permute.xlu1 %25  }
  0x79   :  { %16 = vst.msk [vmem:[#allocation0] sm:$0x1] %vm15_vm2, %v14_v10  }
  0x7a   :  { %22 = vst.msk [vmem:[#allocation0] sm:$0x1] %vm21_vm3, %v20_v9  }
  0x7b   :  { %28 = vst.msk [vmem:[#allocation0] sm:$0x1] %vm27_vm4, %v26_v11  }
  0x7c   :  { %v32_v12 = vpop.permute.xlu0 %31   ;;  %v38_v13 = vpop.permute.xlu1 %37  }
  0x7d   :  { %34 = vst.msk [vmem:[#allocation0] sm:$0x1] %vm33_vm5, %v32_v12  }
  0x7e   :  { %40 = vst.msk [vmem:[#allocation0] sm:$0x1] %vm39_vm6, %v38_v13  }
  0x80   :  { %v44_v14 = vpop.permute.xlu0 %43  }
  0x81   :  { %46 = vst.msk [vmem:[#allocation0] sm:$0x1] %vm45_vm7, %v44_v14  }
  0x88   :  { %v51_v15 = vld [vmem:[#allocation0] sm:$0x1] }
  0x89   :  { %54 = vst [vmem:[%s114_s1] sm:$0x1] %v51_v15 }

// kernel: tile.23
= control target key start
LH: loop header
LB: loop body
LE: loop exit
PB: predicated region body
PF: predicated region fallthrough
CT: control target
= control target key end

     0   :  { %s22_s0 = inlined_call_operand.vmem [shape: f32[32], index: 0, kind: input, shape index: {}]   ;;  %s23_s1 = inlined_call_operand.vmem [shape: f32[4,32], index: 1, kind: output, shape index: {}]  }
   0x1   :  { %v4_v0 = vld [vmem:[%s22_s0] ss:$0 sm:$0xff] }
   0x2   :  { %5 = vst [vmem:[%s23_s1] sm:$0xf] %v4_v0 }

// kernel: tile.28
= control target key start
LH: loop header
LB: loop body
LE: loop exit
PB: predicated region body
PF: predicated region fallthrough
CT: control target
= control target key end

     0   :  { %s22_s0 = inlined_call_operand.vmem [shape: f32[64], index: 0, kind: input, shape index: {}]   ;;  %s23_s1 = inlined_call_operand.vmem [shape: f32[2,64], index: 1, kind: output, shape index: {}]  }
   0x1   :  { %v4_v0 = vld [vmem:[%s22_s0] ss:$0 sm:$0xff] }
   0x2   :  { %5 = vst [vmem:[%s23_s1] sm:$0x3] %v4_v0 }

// kernel: tile.0
= control target key start
LH: loop header
LB: loop body
LE: loop exit
PB: predicated region body
PF: predicated region fallthrough
CT: control target
= control target key end

     0   :  { %s547_s8 = smov 125   ;;  %s548_s9 = smov 126   ;;  %vm8_vm0 = vcmask 7168   ;;  %s1102_s0 = inlined_call_operand.vmem [shape: f32[4,32], index: 0, kind: input, shape index: {}]   ;;  %s1103_s1 = inlined_call_operand.vmem [shape: f32[128,1], index: 1, kind: output, shape index: {}]  }
   0x1   :  { %v5_v0 = vld [vmem:[%s1102_s0] sm:$0xf]  ;;  %s546_s0 = smov 127   ;;  %s549_s10 = smov 124  }
   0x2   :  { %6 = vst [vmem:[#allocation0] sm:$0xf] %v5_v0  ;;  %s550_s11 = smov 123   ;;  %s551_s12 = smov 122  }
   0x3   :  { %s552_s13 = smov 121   ;;  %s553_s14 = smov 120  }
   0x4   :  { %s554_s15 = smov 119   ;;  %s555_s16 = smov 118  }
   0x5   :  { %s556_s17 = smov 117   ;;  %s557_s18 = smov 116  }
   0x6   :  { %s558_s19 = smov 115   ;;  %s559_s20 = smov 114  }
   0x7   :  { %s560_s21 = smov 113   ;;  %s561_s22 = smov 112  }
   0x8   :  { %s562_s23 = smov 111   ;;  %s563_s24 = smov 110  }
   0x9   :  { %v16_v1 = vld [vmem:[#allocation0] sm:$0xf]   ;;  %s564_s25 = smov 109   ;;  %s565_s26 = smov 108  }
   0xa   :  { %v40_v2 = vld [vmem:[#allocation0] sm:$0xf]   ;;  %17 = vrot.lane.b32.xlu0 %v16_v1, %s546_s0  ;;  %s566_s27 = smov 107   ;;  %s567_s28 = smov 106  }
   0xb   :  { %41 = vrot.lane.b32.xlu1 %v40_v2, %s547_s8  ;;  %v28_v3 = vld [vmem:[#allocation0] sm:$0xf]   ;;  %s568_s29 = smov 105   ;;  %s569_s30 = smov 104  }
   0xc   :  { %v52_v4 = vld [vmem:[#allocation0] sm:$0xf]  }
   0xd   :  { %v64_v5 = vld [vmem:[#allocation0] sm:$0xf]  }
   0xe   :  { %29 = vrot.lane.b32.xlu0 %v28_v3, %s548_s9  ;;  %v76_v6 = vld [vmem:[#allocation0] sm:$0xf]   ;;  %s570_s9 = smov 103  }
   0xf   :  { %53 = vrot.lane.b32.xlu1 %v52_v4, %s549_s10  ;;  %v88_v7 = vld [vmem:[#allocation0] sm:$0xf]   ;;  %s571_s10 = smov 102  }
  0x10   :  { %v100_v8 = vld [vmem:[#allocation0] sm:$0xf]  }
  0x11   :  { %v112_v9 = vld [vmem:[#allocation0] sm:$0xf]  }
  0x12   :  { %65 = vrot.lane.b32.xlu0 %v64_v5, %s550_s11  ;;  %v124_v10 = vld [vmem:[#allocation0] sm:$0xf]   ;;  %s572_s11 = smov 101  }
  0x13   :  { %77 = vrot.lane.b32.xlu1 %v76_v6, %s551_s12  ;;  %v136_v11 = vld [vmem:[#allocation0] sm:$0xf]   ;;  %s573_s12 = smov 100  }
  0x14   :  { %v148_v12 = vld [vmem:[#allocation0] sm:$0xf]  }
  0x15   :  { %v160_v13 = vld [vmem:[#allocation0] sm:$0xf]  }
  0x16   :  { %89 = vrot.lane.b32.xlu0 %v88_v7, %s552_s13  ;;  %v172_v14 = vld [vmem:[#allocation0] sm:$0xf]   ;;  %s574_s13 = smov 99  }
  0x17   :  { %101 = vrot.lane.b32.xlu1 %v100_v8, %s553_s14  ;;  %v184_v15 = vld [vmem:[#allocation0] sm:$0xf]   ;;  %s575_s14 = smov 98  }
  0x18   :  { %v196_v16 = vld [vmem:[#allocation0] sm:$0xf]  }
  0x19   :  { %v208_v17 = vld [vmem:[#allocation0] sm:$0xf]  }
  0x1a   :  { %113 = vrot.lane.b32.xlu0 %v112_v9, %s554_s15  ;;  %v220_v18 = vld [vmem:[#allocation0] sm:$0xf]   ;;  %s576_s15 = smov 97  }
  0x1b   :  { %125 = vrot.lane.b32.xlu1 %v124_v10, %s555_s16  ;;  %v232_v19 = vld [vmem:[#allocation0] sm:$0xf]  }
  0x1c   :  { %v244_v20 = vld [vmem:[#allocation0] sm:$0xf]  }
  0x1d   :  { %v256_v21 = vld [vmem:[#allocation0] sm:$0xf]  }
  0x1e   :  { %137 = vrot.lane.b32.xlu0 %v136_v11, %s556_s17  ;;  %v268_v22 = vld [vmem:[#allocation0] sm:$0xf]  }
  0x1f   :  { %149 = vrot.lane.b32.xlu1 %v148_v12, %s557_s18  ;;  %v280_v23 = vld [vmem:[#allocation0] sm:$0xf]  }
  0x20   :  { %v292_v24 = vld [vmem:[#allocation0] sm:$0xf]  }
  0x21   :  { %v304_v25 = vld [vmem:[#allocation0] sm:$0xf]  }
  0x22   :  { %161 = vrot.lane.b32.xlu0 %v160_v13, %s558_s19  ;;  %v316_v26 = vld [vmem:[#allocation0] sm:$0xf]  }
  0x23   :  { %173 = vrot.lane.b32.xlu1 %v172_v14, %s559_s20  ;;  %v7_v27 = vld [vmem:[#allocation0] sm:$0xf]  }
  0x24   :  { %9 = vst.msk [vmem:[%s1103_s1] sm:$0x1] %vm8_vm0, %v7_v27   ;;  %388 = vst.msk [vmem:[%s1103_s1 + $0x1f] sm:$0x2] %vm8_vm0, %v7_v27   ;;  %v328_v28 = vld [vmem:[#allocation0] sm:$0xf]  }
  0x25   :  { %389 = vst.msk [vmem:[%s1103_s1 + $0x3e] sm:$0x4] %vm8_vm0, %v7_v27   ;;  %390 = vst.msk [vmem:[%s1103_s1 + $0x5d] sm:$0x8] %vm8_vm0, %v7_v27   ;;  %v340_v29 = vld [vmem:[#allocation0] sm:$0xf]  }
  0x26   :  { %185 = vrot.lane.b32.xlu0 %v184_v15, %s560_s21  ;;  %v352_v30 = vld [vmem:[#allocation0] sm:$0xf]  }
  0x27   :  { %197 = vrot.lane.b32.xlu1 %v196_v16, %s561_s22  ;;  %v364_v31 = vld [vmem:[#allocation0] sm:$0xf]  }
  0x28   :  { %v376_v32 = vld [vmem:[#allocation0] sm:$0xf]  }
  0x2a   :  { %209 = vrot.lane.b32.xlu0 %v208_v17, %s562_s23 }
  0x2b   :  { %221 = vrot.lane.b32.xlu1 %v220_v18, %s563_s24 }
  0x2e   :  { %233 = vrot.lane.b32.xlu0 %v232_v19, %s564_s25 }
  0x2f   :  { %245 = vrot.lane.b32.xlu1 %v244_v20, %s565_s26 }
  0x32   :  { %257 = vrot.lane.b32.xlu0 %v256_v21, %s566_s27 }
  0x33   :  { %269 = vrot.lane.b32.xlu1 %v268_v22, %s567_s28 }
  0x36   :  { %281 = vrot.lane.b32.xlu0 %v280_v23, %s568_s29 }
  0x37   :  { %293 = vrot.lane.b32.xlu1 %v292_v24, %s569_s30 }
  0x3a   :  { %305 = vrot.lane.b32.xlu0 %v304_v25, %s570_s9 }
  0x3b   :  { %317 = vrot.lane.b32.xlu1 %v316_v26, %s571_s10 }
  0x3e   :  { %329 = vrot.lane.b32.xlu0 %v328_v28, %s572_s11 }
  0x3f   :  { %341 = vrot.lane.b32.xlu1 %v340_v29, %s573_s12 }
  0x42   :  { %353 = vrot.lane.b32.xlu0 %v352_v30, %s574_s13 }
  0x43   :  { %365 = vrot.lane.b32.xlu1 %v364_v31, %s575_s14 }
  0x46   :  { %377 = vrot.lane.b32.xlu0 %v376_v32, %s576_s15 }
  0x7c   :  { %v18_v33 = vpop.permute.xlu0 %17  }
  0x7d   :  { %v42_v34 = vpop.permute.xlu1 %41   ;;  %391 = vst.msk [vmem:[%s1103_s1 + $0x1] sm:$0x1] %vm8_vm0, %v18_v33   ;;  %392 = vst.msk [vmem:[%s1103_s1 + $0x20] sm:$0x2] %vm8_vm0, %v18_v33  }
  0x7e   :  { %393 = vst.msk [vmem:[%s1103_s1 + $0x3f] sm:$0x4] %vm8_vm0, %v18_v33   ;;  %394 = vst.msk [vmem:[%s1103_s1 + $0x5e] sm:$0x8] %vm8_vm0, %v18_v33  }
  0x7f   :  { %399 = vst.msk [vmem:[%s1103_s1 + $0x3] sm:$0x1] %vm8_vm0, %v42_v34   ;;  %400 = vst.msk [vmem:[%s1103_s1 + $0x22] sm:$0x2] %vm8_vm0, %v42_v34  }
  0x80   :  { %401 = vst.msk [vmem:[%s1103_s1 + $0x41] sm:$0x4] %vm8_vm0, %v42_v34   ;;  %402 = vst.msk [vmem:[%s1103_s1 + $0x60] sm:$0x8] %vm8_vm0, %v42_v34   ;;  %v30_v35 = vpop.permute.xlu0 %29  }
  0x81   :  { %v54_v36 = vpop.permute.xlu1 %53   ;;  %395 = vst.msk [vmem:[%s1103_s1 + $0x2] sm:$0x1] %vm8_vm0, %v30_v35   ;;  %396 = vst.msk [vmem:[%s1103_s1 + $0x21] sm:$0x2] %vm8_vm0, %v30_v35  }
  0x82   :  { %397 = vst.msk [vmem:[%s1103_s1 + $0x40] sm:$0x4] %vm8_vm0, %v30_v35   ;;  %398 = vst.msk [vmem:[%s1103_s1 + $0x5f] sm:$0x8] %vm8_vm0, %v30_v35  }
  0x83   :  { %403 = vst.msk [vmem:[%s1103_s1 + $0x4] sm:$0x1] %vm8_vm0, %v54_v36   ;;  %404 = vst.msk [vmem:[%s1103_s1 + $0x23] sm:$0x2] %vm8_vm0, %v54_v36  }
  0x84   :  { %405 = vst.msk [vmem:[%s1103_s1 + $0x42] sm:$0x4] %vm8_vm0, %v54_v36   ;;  %406 = vst.msk [vmem:[%s1103_s1 + $0x61] sm:$0x8] %vm8_vm0, %v54_v36   ;;  %v66_v37 = vpop.permute.xlu0 %65  }
  0x85   :  { %v78_v38 = vpop.permute.xlu1 %77   ;;  %407 = vst.msk [vmem:[%s1103_s1 + $0x5] sm:$0x1] %vm8_vm0, %v66_v37   ;;  %408 = vst.msk [vmem:[%s1103_s1 + $0x24] sm:$0x2] %vm8_vm0, %v66_v37  }
  0x86   :  { %409 = vst.msk [vmem:[%s1103_s1 + $0x43] sm:$0x4] %vm8_vm0, %v66_v37   ;;  %410 = vst.msk [vmem:[%s1103_s1 + $0x62] sm:$0x8] %vm8_vm0, %v66_v37  }
  0x87   :  { %411 = vst.msk [vmem:[%s1103_s1 + $0x6] sm:$0x1] %vm8_vm0, %v78_v38   ;;  %412 = vst.msk [vmem:[%s1103_s1 + $0x25] sm:$0x2] %vm8_vm0, %v78_v38  }
  0x88   :  { %413 = vst.msk [vmem:[%s1103_s1 + $0x44] sm:$0x4] %vm8_vm0, %v78_v38   ;;  %414 = vst.msk [vmem:[%s1103_s1 + $0x63] sm:$0x8] %vm8_vm0, %v78_v38   ;;  %v90_v39 = vpop.permute.xlu0 %89  }
  0x89   :  { %v102_v40 = vpop.permute.xlu1 %101   ;;  %415 = vst.msk [vmem:[%s1103_s1 + $0x7] sm:$0x1] %vm8_vm0, %v90_v39   ;;  %416 = vst.msk [vmem:[%s1103_s1 + $0x26] sm:$0x2] %vm8_vm0, %v90_v39  }
  0x8a   :  { %417 = vst.msk [vmem:[%s1103_s1 + $0x45] sm:$0x4] %vm8_vm0, %v90_v39   ;;  %418 = vst.msk [vmem:[%s1103_s1 + $0x64] sm:$0x8] %vm8_vm0, %v90_v39  }
  0x8b   :  { %419 = vst.msk [vmem:[%s1103_s1 + $0x8] sm:$0x1] %vm8_vm0, %v102_v40   ;;  %420 = vst.msk [vmem:[%s1103_s1 + $0x27] sm:$0x2] %vm8_vm0, %v102_v40  }
  0x8c   :  { %421 = vst.msk [vmem:[%s1103_s1 + $0x46] sm:$0x4] %vm8_vm0, %v102_v40   ;;  %422 = vst.msk [vmem:[%s1103_s1 + $0x65] sm:$0x8] %vm8_vm0, %v102_v40   ;;  %v114_v41 = vpop.permute.xlu0 %113  }
  0x8d   :  { %v126_v42 = vpop.permute.xlu1 %125   ;;  %423 = vst.msk [vmem:[%s1103_s1 + $0x9] sm:$0x1] %vm8_vm0, %v114_v41   ;;  %424 = vst.msk [vmem:[%s1103_s1 + $0x28] sm:$0x2] %vm8_vm0, %v114_v41  }
  0x8e   :  { %425 = vst.msk [vmem:[%s1103_s1 + $0x47] sm:$0x4] %vm8_vm0, %v114_v41   ;;  %426 = vst.msk [vmem:[%s1103_s1 + $0x66] sm:$0x8] %vm8_vm0, %v114_v41  }
  0x8f   :  { %427 = vst.msk [vmem:[%s1103_s1 + $0xa] sm:$0x1] %vm8_vm0, %v126_v42   ;;  %428 = vst.msk [vmem:[%s1103_s1 + $0x29] sm:$0x2] %vm8_vm0, %v126_v42  }
  0x90   :  { %429 = vst.msk [vmem:[%s1103_s1 + $0x48] sm:$0x4] %vm8_vm0, %v126_v42   ;;  %430 = vst.msk [vmem:[%s1103_s1 + $0x67] sm:$0x8] %vm8_vm0, %v126_v42   ;;  %v138_v43 = vpop.permute.xlu0 %137  }
  0x91   :  { %v150_v44 = vpop.permute.xlu1 %149   ;;  %431 = vst.msk [vmem:[%s1103_s1 + $0xb] sm:$0x1] %vm8_vm0, %v138_v43   ;;  %432 = vst.msk [vmem:[%s1103_s1 + $0x2a] sm:$0x2] %vm8_vm0, %v138_v43  }
  0x92   :  { %433 = vst.msk [vmem:[%s1103_s1 + $0x49] sm:$0x4] %vm8_vm0, %v138_v43   ;;  %434 = vst.msk [vmem:[%s1103_s1 + $0x68] sm:$0x8] %vm8_vm0, %v138_v43  }
  0x93   :  { %435 = vst.msk [vmem:[%s1103_s1 + $0xc] sm:$0x1] %vm8_vm0, %v150_v44   ;;  %436 = vst.msk [vmem:[%s1103_s1 + $0x2b] sm:$0x2] %vm8_vm0, %v150_v44  }
  0x94   :  { %437 = vst.msk [vmem:[%s1103_s1 + $0x4a] sm:$0x4] %vm8_vm0, %v150_v44   ;;  %438 = vst.msk [vmem:[%s1103_s1 + $0x69] sm:$0x8] %vm8_vm0, %v150_v44   ;;  %v162_v45 = vpop.permute.xlu0 %161  }
  0x95   :  { %v174_v46 = vpop.permute.xlu1 %173   ;;  %439 = vst.msk [vmem:[%s1103_s1 + $0xd] sm:$0x1] %vm8_vm0, %v162_v45   ;;  %440 = vst.msk [vmem:[%s1103_s1 + $0x2c] sm:$0x2] %vm8_vm0, %v162_v45  }
  0x96   :  { %441 = vst.msk [vmem:[%s1103_s1 + $0x4b] sm:$0x4] %vm8_vm0, %v162_v45   ;;  %442 = vst.msk [vmem:[%s1103_s1 + $0x6a] sm:$0x8] %vm8_vm0, %v162_v45  }
  0x97   :  { %443 = vst.msk [vmem:[%s1103_s1 + $0xe] sm:$0x1] %vm8_vm0, %v174_v46   ;;  %444 = vst.msk [vmem:[%s1103_s1 + $0x2d] sm:$0x2] %vm8_vm0, %v174_v46  }
  0x98   :  { %445 = vst.msk [vmem:[%s1103_s1 + $0x4c] sm:$0x4] %vm8_vm0, %v174_v46   ;;  %446 = vst.msk [vmem:[%s1103_s1 + $0x6b] sm:$0x8] %vm8_vm0, %v174_v46   ;;  %v186_v47 = vpop.permute.xlu0 %185  }
  0x99   :  { %v198_v48 = vpop.permute.xlu1 %197   ;;  %447 = vst.msk [vmem:[%s1103_s1 + $0xf] sm:$0x1] %vm8_vm0, %v186_v47   ;;  %448 = vst.msk [vmem:[%s1103_s1 + $0x2e] sm:$0x2] %vm8_vm0, %v186_v47  }
  0x9a   :  { %449 = vst.msk [vmem:[%s1103_s1 + $0x4d] sm:$0x4] %vm8_vm0, %v186_v47   ;;  %450 = vst.msk [vmem:[%s1103_s1 + $0x6c] sm:$0x8] %vm8_vm0, %v186_v47  }
  0x9b   :  { %451 = vst.msk [vmem:[%s1103_s1 + $0x10] sm:$0x1] %vm8_vm0, %v198_v48   ;;  %452 = vst.msk [vmem:[%s1103_s1 + $0x2f] sm:$0x2] %vm8_vm0, %v198_v48  }
  0x9c   :  { %453 = vst.msk [vmem:[%s1103_s1 + $0x4e] sm:$0x4] %vm8_vm0, %v198_v48   ;;  %454 = vst.msk [vmem:[%s1103_s1 + $0x6d] sm:$0x8] %vm8_vm0, %v198_v48   ;;  %v210_v49 = vpop.permute.xlu0 %209  }
  0x9d   :  { %v222_v50 = vpop.permute.xlu1 %221   ;;  %455 = vst.msk [vmem:[%s1103_s1 + $0x11] sm:$0x1] %vm8_vm0, %v210_v49   ;;  %456 = vst.msk [vmem:[%s1103_s1 + $0x30] sm:$0x2] %vm8_vm0, %v210_v49  }
  0x9e   :  { %457 = vst.msk [vmem:[%s1103_s1 + $0x4f] sm:$0x4] %vm8_vm0, %v210_v49   ;;  %458 = vst.msk [vmem:[%s1103_s1 + $0x6e] sm:$0x8] %vm8_vm0, %v210_v49  }
  0x9f   :  { %459 = vst.msk [vmem:[%s1103_s1 + $0x12] sm:$0x1] %vm8_vm0, %v222_v50   ;;  %460 = vst.msk [vmem:[%s1103_s1 + $0x31] sm:$0x2] %vm8_vm0, %v222_v50  }
  0xa0   :  { %461 = vst.msk [vmem:[%s1103_s1 + $0x50] sm:$0x4] %vm8_vm0, %v222_v50   ;;  %462 = vst.msk [vmem:[%s1103_s1 + $0x6f] sm:$0x8] %vm8_vm0, %v222_v50   ;;  %v234_v51 = vpop.permute.xlu0 %233  }
  0xa1   :  { %v246_v52 = vpop.permute.xlu1 %245   ;;  %463 = vst.msk [vmem:[%s1103_s1 + $0x13] sm:$0x1] %vm8_vm0, %v234_v51   ;;  %464 = vst.msk [vmem:[%s1103_s1 + $0x32] sm:$0x2] %vm8_vm0, %v234_v51  }
  0xa2   :  { %465 = vst.msk [vmem:[%s1103_s1 + $0x51] sm:$0x4] %vm8_vm0, %v234_v51   ;;  %466 = vst.msk [vmem:[%s1103_s1 + $0x70] sm:$0x8] %vm8_vm0, %v234_v51  }
  0xa3   :  { %467 = vst.msk [vmem:[%s1103_s1 + $0x14] sm:$0x1] %vm8_vm0, %v246_v52   ;;  %468 = vst.msk [vmem:[%s1103_s1 + $0x33] sm:$0x2] %vm8_vm0, %v246_v52  }
  0xa4   :  { %469 = vst.msk [vmem:[%s1103_s1 + $0x52] sm:$0x4] %vm8_vm0, %v246_v52   ;;  %470 = vst.msk [vmem:[%s1103_s1 + $0x71] sm:$0x8] %vm8_vm0, %v246_v52   ;;  %v258_v53 = vpop.permute.xlu0 %257  }
  0xa5   :  { %v270_v54 = vpop.permute.xlu1 %269   ;;  %471 = vst.msk [vmem:[%s1103_s1 + $0x15] sm:$0x1] %vm8_vm0, %v258_v53   ;;  %472 = vst.msk [vmem:[%s1103_s1 + $0x34] sm:$0x2] %vm8_vm0, %v258_v53  }
  0xa6   :  { %473 = vst.msk [vmem:[%s1103_s1 + $0x53] sm:$0x4] %vm8_vm0, %v258_v53   ;;  %474 = vst.msk [vmem:[%s1103_s1 + $0x72] sm:$0x8] %vm8_vm0, %v258_v53  }
  0xa7   :  { %475 = vst.msk [vmem:[%s1103_s1 + $0x16] sm:$0x1] %vm8_vm0, %v270_v54   ;;  %476 = vst.msk [vmem:[%s1103_s1 + $0x35] sm:$0x2] %vm8_vm0, %v270_v54  }
  0xa8   :  { %477 = vst.msk [vmem:[%s1103_s1 + $0x54] sm:$0x4] %vm8_vm0, %v270_v54   ;;  %478 = vst.msk [vmem:[%s1103_s1 + $0x73] sm:$0x8] %vm8_vm0, %v270_v54   ;;  %v282_v55 = vpop.permute.xlu0 %281  }
  0xa9   :  { %v294_v56 = vpop.permute.xlu1 %293   ;;  %479 = vst.msk [vmem:[%s1103_s1 + $0x17] sm:$0x1] %vm8_vm0, %v282_v55   ;;  %480 = vst.msk [vmem:[%s1103_s1 + $0x36] sm:$0x2] %vm8_vm0, %v282_v55  }
  0xaa   :  { %481 = vst.msk [vmem:[%s1103_s1 + $0x55] sm:$0x4] %vm8_vm0, %v282_v55   ;;  %482 = vst.msk [vmem:[%s1103_s1 + $0x74] sm:$0x8] %vm8_vm0, %v282_v55  }
  0xab   :  { %483 = vst.msk [vmem:[%s1103_s1 + $0x18] sm:$0x1] %vm8_vm0, %v294_v56   ;;  %484 = vst.msk [vmem:[%s1103_s1 + $0x37] sm:$0x2] %vm8_vm0, %v294_v56  }
  0xac   :  { %485 = vst.msk [vmem:[%s1103_s1 + $0x56] sm:$0x4] %vm8_vm0, %v294_v56   ;;  %486 = vst.msk [vmem:[%s1103_s1 + $0x75] sm:$0x8] %vm8_vm0, %v294_v56   ;;  %v306_v57 = vpop.permute.xlu0 %305  }
  0xad   :  { %v318_v58 = vpop.permute.xlu1 %317   ;;  %487 = vst.msk [vmem:[%s1103_s1 + $0x19] sm:$0x1] %vm8_vm0, %v306_v57   ;;  %488 = vst.msk [vmem:[%s1103_s1 + $0x38] sm:$0x2] %vm8_vm0, %v306_v57  }
  0xae   :  { %489 = vst.msk [vmem:[%s1103_s1 + $0x57] sm:$0x4] %vm8_vm0, %v306_v57   ;;  %490 = vst.msk [vmem:[%s1103_s1 + $0x76] sm:$0x8] %vm8_vm0, %v306_v57  }
  0xaf   :  { %491 = vst.msk [vmem:[%s1103_s1 + $0x1a] sm:$0x1] %vm8_vm0, %v318_v58   ;;  %492 = vst.msk [vmem:[%s1103_s1 + $0x39] sm:$0x2] %vm8_vm0, %v318_v58  }
  0xb0   :  { %493 = vst.msk [vmem:[%s1103_s1 + $0x58] sm:$0x4] %vm8_vm0, %v318_v58   ;;  %494 = vst.msk [vmem:[%s1103_s1 + $0x77] sm:$0x8] %vm8_vm0, %v318_v58   ;;  %v330_v59 = vpop.permute.xlu0 %329  }
  0xb1   :  { %v342_v60 = vpop.permute.xlu1 %341   ;;  %495 = vst.msk [vmem:[%s1103_s1 + $0x1b] sm:$0x1] %vm8_vm0, %v330_v59   ;;  %496 = vst.msk [vmem:[%s1103_s1 + $0x3a] sm:$0x2] %vm8_vm0, %v330_v59  }
  0xb2   :  { %497 = vst.msk [vmem:[%s1103_s1 + $0x59] sm:$0x4] %vm8_vm0, %v330_v59   ;;  %498 = vst.msk [vmem:[%s1103_s1 + $0x78] sm:$0x8] %vm8_vm0, %v330_v59  }
  0xb3   :  { %499 = vst.msk [vmem:[%s1103_s1 + $0x1c] sm:$0x1] %vm8_vm0, %v342_v60   ;;  %500 = vst.msk [vmem:[%s1103_s1 + $0x3b] sm:$0x2] %vm8_vm0, %v342_v60  }
  0xb4   :  { %501 = vst.msk [vmem:[%s1103_s1 + $0x5a] sm:$0x4] %vm8_vm0, %v342_v60   ;;  %502 = vst.msk [vmem:[%s1103_s1 + $0x79] sm:$0x8] %vm8_vm0, %v342_v60   ;;  %v354_v61 = vpop.permute.xlu0 %353  }
  0xb5   :  { %v366_v62 = vpop.permute.xlu1 %365   ;;  %503 = vst.msk [vmem:[%s1103_s1 + $0x1d] sm:$0x1] %vm8_vm0, %v354_v61   ;;  %504 = vst.msk [vmem:[%s1103_s1 + $0x3c] sm:$0x2] %vm8_vm0, %v354_v61  }
  0xb6   :  { %505 = vst.msk [vmem:[%s1103_s1 + $0x5b] sm:$0x4] %vm8_vm0, %v354_v61   ;;  %506 = vst.msk [vmem:[%s1103_s1 + $0x7a] sm:$0x8] %vm8_vm0, %v354_v61  }
  0xb7   :  { %507 = vst.msk [vmem:[%s1103_s1 + $0x1e] sm:$0x1] %vm8_vm0, %v366_v62   ;;  %508 = vst.msk [vmem:[%s1103_s1 + $0x3d] sm:$0x2] %vm8_vm0, %v366_v62  }
  0xb8   :  { %509 = vst.msk [vmem:[%s1103_s1 + $0x5c] sm:$0x4] %vm8_vm0, %v366_v62   ;;  %510 = vst.msk [vmem:[%s1103_s1 + $0x7b] sm:$0x8] %vm8_vm0, %v366_v62   ;;  %v378_v63 = vpop.permute.xlu0 %377  }
  0xb9   :  { %511 = vst.msk [vmem:[%s1103_s1 + $0x1f] sm:$0x1] %vm8_vm0, %v378_v63   ;;  %512 = vst.msk [vmem:[%s1103_s1 + $0x3e] sm:$0x2] %vm8_vm0, %v378_v63  }
  0xba   :  { %513 = vst.msk [vmem:[%s1103_s1 + $0x5d] sm:$0x4] %vm8_vm0, %v378_v63   ;;  %514 = vst.msk [vmem:[%s1103_s1 + $0x7c] sm:$0x8] %vm8_vm0, %v378_v63  }

// kernel: tile.1
= control target key start
LH: loop header
LB: loop body
LE: loop exit
PB: predicated region body
PF: predicated region fallthrough
CT: control target
= control target key end

     0   :  { %s707_s8 = smov 125   ;;  %s708_s9 = smov 126   ;;  %vm8_vm0 = vcmask 7168   ;;  %s1294_s0 = inlined_call_operand.vmem [shape: f32[2,64], index: 0, kind: input, shape index: {}]   ;;  %s1295_s1 = inlined_call_operand.vmem [shape: f32[128,1], index: 1, kind: output, shape index: {}]  }
   0x1   :  { %v5_v0 = vld [vmem:[%s1294_s0] sm:$0x3]  ;;  %s706_s0 = smov 127   ;;  %s709_s10 = smov 124  }
   0x2   :  { %6 = vst [vmem:[#allocation0] sm:$0x3] %v5_v0  ;;  %s710_s11 = smov 123   ;;  %s711_s12 = smov 122  }
   0x3   :  { %s712_s13 = smov 121   ;;  %s713_s14 = smov 120  }
   0x4   :  { %s714_s15 = smov 119   ;;  %s715_s16 = smov 118  }
   0x5   :  { %s716_s17 = smov 117   ;;  %s717_s18 = smov 116  }
   0x6   :  { %s718_s19 = smov 115   ;;  %s719_s20 = smov 114  }
   0x7   :  { %s720_s21 = smov 113   ;;  %s721_s22 = smov 112  }
   0x8   :  { %s722_s23 = smov 111   ;;  %s723_s24 = smov 110  }
   0x9   :  { %v12_v1 = vld [vmem:[#allocation0] sm:$0x3]   ;;  %s724_s25 = smov 109   ;;  %s725_s26 = smov 108  }
   0xa   :  { %v28_v2 = vld [vmem:[#allocation0] sm:$0x3]   ;;  %13 = vrot.lane.b32.xlu0 %v12_v1, %s706_s0  ;;  %s726_s27 = smov 107   ;;  %s727_s28 = smov 106  }
   0xb   :  { %29 = vrot.lane.b32.xlu1 %v28_v2, %s707_s8  ;;  %v20_v3 = vld [vmem:[#allocation0] sm:$0x3]   ;;  %s728_s29 = smov 105   ;;  %s729_s30 = smov 104  }
   0xc   :  { %v36_v4 = vld [vmem:[#allocation0] sm:$0x3]   ;;  %s730_s2 = smov 103   ;;  %s731_s3 = smov 102  }
   0xd   :  { %v44_v5 = vld [vmem:[#allocation0] sm:$0x3]   ;;  %s732_s4 = smov 101   ;;  %s733_s5 = smov 100  }
   0xe   :  { %21 = vrot.lane.b32.xlu0 %v20_v3, %s708_s9  ;;  %v52_v6 = vld [vmem:[#allocation0] sm:$0x3]   ;;  %s734_s6 = smov 99   ;;  %s735_s7 = smov 98  }
   0xf   :  { %37 = vrot.lane.b32.xlu1 %v36_v4, %s709_s10  ;;  %v60_v7 = vld [vmem:[#allocation0] sm:$0x3]   ;;  %s736_s0 = smov 97   ;;  %s737_s8 = smov 96  }
  0x10   :  { %v68_v8 = vld [vmem:[#allocation0] sm:$0x3]   ;;  %s738_s9 = smov 95   ;;  %s739_s10 = smov 94  }
  0x11   :  { %v76_v9 = vld [vmem:[#allocation0] sm:$0x3]  }
  0x12   :  { %45 = vrot.lane.b32.xlu0 %v44_v5, %s710_s11  ;;  %v84_v10 = vld [vmem:[#allocation0] sm:$0x3]   ;;  %s740_s11 = smov 93  }
  0x13   :  { %53 = vrot.lane.b32.xlu1 %v52_v6, %s711_s12  ;;  %v92_v11 = vld [vmem:[#allocation0] sm:$0x3]   ;;  %s741_s12 = smov 92  }
  0x14   :  { %v100_v12 = vld [vmem:[#allocation0] sm:$0x3]  }
  0x15   :  { %v108_v13 = vld [vmem:[#allocation0] sm:$0x3]  }
  0x16   :  { %61 = vrot.lane.b32.xlu0 %v60_v7, %s712_s13  ;;  %v116_v14 = vld [vmem:[#allocation0] sm:$0x3]   ;;  %s742_s13 = smov 91  }
  0x17   :  { %69 = vrot.lane.b32.xlu1 %v68_v8, %s713_s14  ;;  %v124_v15 = vld [vmem:[#allocation0] sm:$0x3]   ;;  %s743_s14 = smov 90  }
  0x18   :  { %v132_v16 = vld [vmem:[#allocation0] sm:$0x3]  }
  0x19   :  { %v140_v17 = vld [vmem:[#allocation0] sm:$0x3]  }
  0x1a   :  { %77 = vrot.lane.b32.xlu0 %v76_v9, %s714_s15  ;;  %v148_v18 = vld [vmem:[#allocation0] sm:$0x3]   ;;  %s744_s15 = smov 89  }
  0x1b   :  { %85 = vrot.lane.b32.xlu1 %v84_v10, %s715_s16  ;;  %v156_v19 = vld [vmem:[#allocation0] sm:$0x3]   ;;  %s745_s16 = smov 88  }
  0x1c   :  { %v164_v20 = vld [vmem:[#allocation0] sm:$0x3]  }
  0x1d   :  { %v172_v21 = vld [vmem:[#allocation0] sm:$0x3]  }
  0x1e   :  { %93 = vrot.lane.b32.xlu0 %v92_v11, %s716_s17  ;;  %v180_v22 = vld [vmem:[#allocation0] sm:$0x3]   ;;  %s746_s17 = smov 87  }
  0x1f   :  { %101 = vrot.lane.b32.xlu1 %v100_v12, %s717_s18  ;;  %v188_v23 = vld [vmem:[#allocation0] sm:$0x3]   ;;  %s747_s18 = smov 86  }
  0x20   :  { %v196_v24 = vld [vmem:[#allocation0] sm:$0x3]  }
  0x21   :  { %v204_v25 = vld [vmem:[#allocation0] sm:$0x3]  }
  0x22   :  { %109 = vrot.lane.b32.xlu0 %v108_v13, %s718_s19  ;;  %v212_v26 = vld [vmem:[#allocation0] sm:$0x3]   ;;  %s748_s19 = smov 85  }
  0x23   :  { %117 = vrot.lane.b32.xlu1 %v116_v14, %s719_s20  ;;  %v220_v27 = vld [vmem:[#allocation0] sm:$0x3]   ;;  %s749_s20 = smov 84  }
  0x24   :  { %v228_v28 = vld [vmem:[#allocation0] sm:$0x3]  }
  0x25   :  { %v236_v29 = vld [vmem:[#allocation0] sm:$0x3]  }
  0x26   :  { %125 = vrot.lane.b32.xlu0 %v124_v15, %s720_s21  ;;  %v244_v30 = vld [vmem:[#allocation0] sm:$0x3]   ;;  %s750_s21 = smov 83  }
  0x27   :  { %133 = vrot.lane.b32.xlu1 %v132_v16, %s721_s22  ;;  %v252_v31 = vld [vmem:[#allocation0] sm:$0x3]   ;;  %s751_s22 = smov 82  }
  0x28   :  { %v260_v32 = vld [vmem:[#allocation0] sm:$0x3]  }
  0x29   :  { %v268_v33 = vld [vmem:[#allocation0] sm:$0x3]  }
  0x2a   :  { %141 = vrot.lane.b32.xlu0 %v140_v17, %s722_s23  ;;  %v276_v34 = vld [vmem:[#allocation0] sm:$0x3]   ;;  %s752_s23 = smov 81  }
  0x2b   :  { %149 = vrot.lane.b32.xlu1 %v148_v18, %s723_s24  ;;  %v284_v35 = vld [vmem:[#allocation0] sm:$0x3]   ;;  %s753_s24 = smov 80  }
  0x2c   :  { %v292_v36 = vld [vmem:[#allocation0] sm:$0x3]  }
  0x2d   :  { %v300_v37 = vld [vmem:[#allocation0] sm:$0x3]  }
  0x2e   :  { %157 = vrot.lane.b32.xlu0 %v156_v19, %s724_s25  ;;  %v308_v38 = vld [vmem:[#allocation0] sm:$0x3]   ;;  %s754_s25 = smov 79  }
  0x2f   :  { %165 = vrot.lane.b32.xlu1 %v164_v20, %s725_s26  ;;  %v316_v39 = vld [vmem:[#allocation0] sm:$0x3]   ;;  %s755_s26 = smov 78  }
  0x30   :  { %v324_v40 = vld [vmem:[#allocation0] sm:$0x3]  }
  0x31   :  { %v332_v41 = vld [vmem:[#allocation0] sm:$0x3]  }
  0x32   :  { %173 = vrot.lane.b32.xlu0 %v172_v21, %s726_s27  ;;  %v340_v42 = vld [vmem:[#allocation0] sm:$0x3]   ;;  %s756_s27 = smov 77  }
  0x33   :  { %181 = vrot.lane.b32.xlu1 %v180_v22, %s727_s28  ;;  %v348_v43 = vld [vmem:[#allocation0] sm:$0x3]   ;;  %s757_s28 = smov 76  }
  0x34   :  { %v356_v44 = vld [vmem:[#allocation0] sm:$0x3]  }
  0x35   :  { %v364_v45 = vld [vmem:[#allocation0] sm:$0x3]  }
  0x36   :  { %189 = vrot.lane.b32.xlu0 %v188_v23, %s728_s29  ;;  %v372_v46 = vld [vmem:[#allocation0] sm:$0x3]   ;;  %s758_s29 = smov 75  }
  0x37   :  { %197 = vrot.lane.b32.xlu1 %v196_v24, %s729_s30  ;;  %v380_v47 = vld [vmem:[#allocation0] sm:$0x3]   ;;  %s759_s30 = smov 74  }
  0x38   :  { %v388_v48 = vld [vmem:[#allocation0] sm:$0x3]  }
  0x39   :  { %v396_v49 = vld [vmem:[#allocation0] sm:$0x3]  }
  0x3a   :  { %205 = vrot.lane.b32.xlu0 %v204_v25, %s730_s2  ;;  %v404_v50 = vld [vmem:[#allocation0] sm:$0x3]   ;;  %s760_s2 = smov 73  }
  0x3b   :  { %213 = vrot.lane.b32.xlu1 %v212_v26, %s731_s3  ;;  %v412_v51 = vld [vmem:[#allocation0] sm:$0x3]   ;;  %s761_s3 = smov 72  }
  0x3c   :  { %v420_v52 = vld [vmem:[#allocation0] sm:$0x3]  }
  0x3d   :  { %v428_v53 = vld [vmem:[#allocation0] sm:$0x3]  }
  0x3e   :  { %221 = vrot.lane.b32.xlu0 %v220_v27, %s732_s4  ;;  %v436_v54 = vld [vmem:[#allocation0] sm:$0x3]  }
  0x3f   :  { %229 = vrot.lane.b32.xlu1 %v228_v28, %s733_s5  ;;  %v444_v55 = vld [vmem:[#allocation0] sm:$0x3]  }
  0x40   :  { %v452_v56 = vld [vmem:[#allocation0] sm:$0x3]  }
  0x41   :  { %v460_v57 = vld [vmem:[#allocation0] sm:$0x3]  }
  0x42   :  { %237 = vrot.lane.b32.xlu0 %v236_v29, %s734_s6  ;;  %v468_v58 = vld [vmem:[#allocation0] sm:$0x3]  }
  0x43   :  { %245 = vrot.lane.b32.xlu1 %v244_v30, %s735_s7  ;;  %v7_v59 = vld [vmem:[#allocation0] sm:$0x3]  }
  0x44   :  { %9 = vst.msk [vmem:[%s1295_s1] sm:$0x1] %vm8_vm0, %v7_v59   ;;  %516 = vst.msk [vmem:[%s1295_s1 + $0x3f] sm:$0x2] %vm8_vm0, %v7_v59   ;;  %v476_v60 = vld [vmem:[#allocation0] sm:$0x3]  }
  0x45   :  { %v484_v61 = vld [vmem:[#allocation0] sm:$0x3]  }
  0x46   :  { %253 = vrot.lane.b32.xlu0 %v252_v31, %s736_s0  ;;  %s762_s0 = smov 71   ;;  %v492_v0 = vld [vmem:[#allocation0] sm:$0x3]  }
  0x47   :  { %261 = vrot.lane.b32.xlu1 %v260_v32, %s737_s8  ;;  %s763_s8 = smov 70   ;;  %v500_v1 = vld [vmem:[#allocation0] sm:$0x3]  }
  0x48   :  { %v508_v4 = vld [vmem:[#allocation0] sm:$0x3]  }
  0x4a   :  { %269 = vrot.lane.b32.xlu0 %v268_v33, %s738_s9 }
  0x4b   :  { %277 = vrot.lane.b32.xlu1 %v276_v34, %s739_s10 }
  0x4e   :  { %285 = vrot.lane.b32.xlu0 %v284_v35, %s740_s11 }
  0x4f   :  { %293 = vrot.lane.b32.xlu1 %v292_v36, %s741_s12 }
  0x52   :  { %301 = vrot.lane.b32.xlu0 %v300_v37, %s742_s13 }
  0x53   :  { %309 = vrot.lane.b32.xlu1 %v308_v38, %s743_s14 }
  0x56   :  { %317 = vrot.lane.b32.xlu0 %v316_v39, %s744_s15 }
  0x57   :  { %325 = vrot.lane.b32.xlu1 %v324_v40, %s745_s16 }
  0x5a   :  { %333 = vrot.lane.b32.xlu0 %v332_v41, %s746_s17  ;;  %s764_s17 = smov 69  }
  0x5b   :  { %341 = vrot.lane.b32.xlu1 %v340_v42, %s747_s18  ;;  %s765_s18 = smov 68  }
  0x5e   :  { %349 = vrot.lane.b32.xlu0 %v348_v43, %s748_s19 }
  0x5f   :  { %357 = vrot.lane.b32.xlu1 %v356_v44, %s749_s20 }
  0x62   :  { %365 = vrot.lane.b32.xlu0 %v364_v45, %s750_s21 }
  0x63   :  { %373 = vrot.lane.b32.xlu1 %v372_v46, %s751_s22 }
  0x66   :  { %381 = vrot.lane.b32.xlu0 %v380_v47, %s752_s23 }
  0x67   :  { %389 = vrot.lane.b32.xlu1 %v388_v48, %s753_s24 }
  0x6a   :  { %397 = vrot.lane.b32.xlu0 %v396_v49, %s754_s25 }
  0x6b   :  { %405 = vrot.lane.b32.xlu1 %v404_v50, %s755_s26 }
  0x6e   :  { %413 = vrot.lane.b32.xlu0 %v412_v51, %s756_s27  ;;  %s766_s27 = smov 67  }
  0x6f   :  { %421 = vrot.lane.b32.xlu1 %v420_v52, %s757_s28  ;;  %s767_s28 = smov 66  }
  0x72   :  { %429 = vrot.lane.b32.xlu0 %v428_v53, %s758_s29 }
  0x73   :  { %437 = vrot.lane.b32.xlu1 %v436_v54, %s759_s30 }
  0x76   :  { %445 = vrot.lane.b32.xlu0 %v444_v55, %s760_s2 }
  0x77   :  { %453 = vrot.lane.b32.xlu1 %v452_v56, %s761_s3 }
  0x7a   :  { %461 = vrot.lane.b32.xlu0 %v460_v57, %s762_s0  ;;  %s768_s0 = smov 65  }
  0x7b   :  { %469 = vrot.lane.b32.xlu1 %v468_v58, %s763_s8 }
  0x7c   :  { %v14_v62 = vpop.permute.xlu0 %13  }
  0x7d   :  { %v30_v63 = vpop.permute.xlu1 %29   ;;  %517 = vst.msk [vmem:[%s1295_s1 + $0x1] sm:$0x1] %vm8_vm0, %v14_v62   ;;  %518 = vst.msk [vmem:[%s1295_s1 + $0x40] sm:$0x2] %vm8_vm0, %v14_v62  }
  0x7e   :  { %521 = vst.msk [vmem:[%s1295_s1 + $0x3] sm:$0x1] %vm8_vm0, %v30_v63   ;;  %522 = vst.msk [vmem:[%s1295_s1 + $0x42] sm:$0x2] %vm8_vm0, %v30_v63   ;;  %477 = vrot.lane.b32.xlu0 %v476_v60, %s764_s17 }
  0x7f   :  { %485 = vrot.lane.b32.xlu1 %v484_v61, %s765_s18 }
  0x80   :  { %v22_v2 = vpop.permute.xlu0 %21  }
  0x81   :  { %v38_v3 = vpop.permute.xlu1 %37   ;;  %519 = vst.msk [vmem:[%s1295_s1 + $0x2] sm:$0x1] %vm8_vm0, %v22_v2   ;;  %520 = vst.msk [vmem:[%s1295_s1 + $0x41] sm:$0x2] %vm8_vm0, %v22_v2  }
  0x82   :  { %523 = vst.msk [vmem:[%s1295_s1 + $0x4] sm:$0x1] %vm8_vm0, %v38_v3   ;;  %524 = vst.msk [vmem:[%s1295_s1 + $0x43] sm:$0x2] %vm8_vm0, %v38_v3   ;;  %493 = vrot.lane.b32.xlu0 %v492_v0, %s766_s27 }
  0x83   :  { %501 = vrot.lane.b32.xlu1 %v500_v1, %s767_s28 }
  0x84   :  { %v46_v5 = vpop.permute.xlu0 %45  }
  0x85   :  { %v54_v6 = vpop.permute.xlu1 %53   ;;  %525 = vst.msk [vmem:[%s1295_s1 + $0x5] sm:$0x1] %vm8_vm0, %v46_v5   ;;  %526 = vst.msk [vmem:[%s1295_s1 + $0x44] sm:$0x2] %vm8_vm0, %v46_v5  }
  0x86   :  { %527 = vst.msk [vmem:[%s1295_s1 + $0x6] sm:$0x1] %vm8_vm0, %v54_v6   ;;  %528 = vst.msk [vmem:[%s1295_s1 + $0x45] sm:$0x2] %vm8_vm0, %v54_v6   ;;  %509 = vrot.lane.b32.xlu0 %v508_v4, %s768_s0 }
  0x88   :  { %v62_v7 = vpop.permute.xlu0 %61  }
  0x89   :  { %v70_v8 = vpop.permute.xlu1 %69   ;;  %529 = vst.msk [vmem:[%s1295_s1 + $0x7] sm:$0x1] %vm8_vm0, %v62_v7   ;;  %530 = vst.msk [vmem:[%s1295_s1 + $0x46] sm:$0x2] %vm8_vm0, %v62_v7  }
  0x8a   :  { %531 = vst.msk [vmem:[%s1295_s1 + $0x8] sm:$0x1] %vm8_vm0, %v70_v8   ;;  %532 = vst.msk [vmem:[%s1295_s1 + $0x47] sm:$0x2] %vm8_vm0, %v70_v8  }
  0x8c   :  { %v78_v9 = vpop.permute.xlu0 %77  }
  0x8d   :  { %v86_v10 = vpop.permute.xlu1 %85   ;;  %533 = vst.msk [vmem:[%s1295_s1 + $0x9] sm:$0x1] %vm8_vm0, %v78_v9   ;;  %534 = vst.msk [vmem:[%s1295_s1 + $0x48] sm:$0x2] %vm8_vm0, %v78_v9  }
  0x8e   :  { %535 = vst.msk [vmem:[%s1295_s1 + $0xa] sm:$0x1] %vm8_vm0, %v86_v10   ;;  %536 = vst.msk [vmem:[%s1295_s1 + $0x49] sm:$0x2] %vm8_vm0, %v86_v10  }
  0x90   :  { %v94_v11 = vpop.permute.xlu0 %93  }
  0x91   :  { %v102_v12 = vpop.permute.xlu1 %101   ;;  %537 = vst.msk [vmem:[%s1295_s1 + $0xb] sm:$0x1] %vm8_vm0, %v94_v11   ;;  %538 = vst.msk [vmem:[%s1295_s1 + $0x4a] sm:$0x2] %vm8_vm0, %v94_v11  }
  0x92   :  { %539 = vst.msk [vmem:[%s1295_s1 + $0xc] sm:$0x1] %vm8_vm0, %v102_v12   ;;  %540 = vst.msk [vmem:[%s1295_s1 + $0x4b] sm:$0x2] %vm8_vm0, %v102_v12  }
  0x94   :  { %v110_v13 = vpop.permute.xlu0 %109  }
  0x95   :  { %v118_v14 = vpop.permute.xlu1 %117   ;;  %541 = vst.msk [vmem:[%s1295_s1 + $0xd] sm:$0x1] %vm8_vm0, %v110_v13   ;;  %542 = vst.msk [vmem:[%s1295_s1 + $0x4c] sm:$0x2] %vm8_vm0, %v110_v13  }
  0x96   :  { %543 = vst.msk [vmem:[%s1295_s1 + $0xe] sm:$0x1] %vm8_vm0, %v118_v14   ;;  %544 = vst.msk [vmem:[%s1295_s1 + $0x4d] sm:$0x2] %vm8_vm0, %v118_v14  }
  0x98   :  { %v126_v15 = vpop.permute.xlu0 %125  }
  0x99   :  { %v134_v16 = vpop.permute.xlu1 %133   ;;  %545 = vst.msk [vmem:[%s1295_s1 + $0xf] sm:$0x1] %vm8_vm0, %v126_v15   ;;  %546 = vst.msk [vmem:[%s1295_s1 + $0x4e] sm:$0x2] %vm8_vm0, %v126_v15  }
  0x9a   :  { %547 = vst.msk [vmem:[%s1295_s1 + $0x10] sm:$0x1] %vm8_vm0, %v134_v16   ;;  %548 = vst.msk [vmem:[%s1295_s1 + $0x4f] sm:$0x2] %vm8_vm0, %v134_v16  }
  0x9c   :  { %v142_v17 = vpop.permute.xlu0 %141  }
  0x9d   :  { %v150_v18 = vpop.permute.xlu1 %149   ;;  %549 = vst.msk [vmem:[%s1295_s1 + $0x11] sm:$0x1] %vm8_vm0, %v142_v17   ;;  %550 = vst.msk [vmem:[%s1295_s1 + $0x50] sm:$0x2] %vm8_vm0, %v142_v17  }
  0x9e   :  { %551 = vst.msk [vmem:[%s1295_s1 + $0x12] sm:$0x1] %vm8_vm0, %v150_v18   ;;  %552 = vst.msk [vmem:[%s1295_s1 + $0x51] sm:$0x2] %vm8_vm0, %v150_v18  }
  0xa0   :  { %v158_v19 = vpop.permute.xlu0 %157  }
  0xa1   :  { %v166_v20 = vpop.permute.xlu1 %165   ;;  %553 = vst.msk [vmem:[%s1295_s1 + $0x13] sm:$0x1] %vm8_vm0, %v158_v19   ;;  %554 = vst.msk [vmem:[%s1295_s1 + $0x52] sm:$0x2] %vm8_vm0, %v158_v19  }
  0xa2   :  { %555 = vst.msk [vmem:[%s1295_s1 + $0x14] sm:$0x1] %vm8_vm0, %v166_v20   ;;  %556 = vst.msk [vmem:[%s1295_s1 + $0x53] sm:$0x2] %vm8_vm0, %v166_v20  }
  0xa4   :  { %v174_v21 = vpop.permute.xlu0 %173  }
  0xa5   :  { %v182_v22 = vpop.permute.xlu1 %181   ;;  %557 = vst.msk [vmem:[%s1295_s1 + $0x15] sm:$0x1] %vm8_vm0, %v174_v21   ;;  %558 = vst.msk [vmem:[%s1295_s1 + $0x54] sm:$0x2] %vm8_vm0, %v174_v21  }
  0xa6   :  { %559 = vst.msk [vmem:[%s1295_s1 + $0x16] sm:$0x1] %vm8_vm0, %v182_v22   ;;  %560 = vst.msk [vmem:[%s1295_s1 + $0x55] sm:$0x2] %vm8_vm0, %v182_v22  }
  0xa8   :  { %v190_v23 = vpop.permute.xlu0 %189  }
  0xa9   :  { %v198_v24 = vpop.permute.xlu1 %197   ;;  %561 = vst.msk [vmem:[%s1295_s1 + $0x17] sm:$0x1] %vm8_vm0, %v190_v23   ;;  %562 = vst.msk [vmem:[%s1295_s1 + $0x56] sm:$0x2] %vm8_vm0, %v190_v23  }
  0xaa   :  { %563 = vst.msk [vmem:[%s1295_s1 + $0x18] sm:$0x1] %vm8_vm0, %v198_v24   ;;  %564 = vst.msk [vmem:[%s1295_s1 + $0x57] sm:$0x2] %vm8_vm0, %v198_v24  }
  0xac   :  { %v206_v25 = vpop.permute.xlu0 %205  }
  0xad   :  { %v214_v26 = vpop.permute.xlu1 %213   ;;  %565 = vst.msk [vmem:[%s1295_s1 + $0x19] sm:$0x1] %vm8_vm0, %v206_v25   ;;  %566 = vst.msk [vmem:[%s1295_s1 + $0x58] sm:$0x2] %vm8_vm0, %v206_v25  }
  0xae   :  { %567 = vst.msk [vmem:[%s1295_s1 + $0x1a] sm:$0x1] %vm8_vm0, %v214_v26   ;;  %568 = vst.msk [vmem:[%s1295_s1 + $0x59] sm:$0x2] %vm8_vm0, %v214_v26  }
  0xb0   :  { %v222_v27 = vpop.permute.xlu0 %221  }
  0xb1   :  { %v230_v28 = vpop.permute.xlu1 %229   ;;  %569 = vst.msk [vmem:[%s1295_s1 + $0x1b] sm:$0x1] %vm8_vm0, %v222_v27   ;;  %570 = vst.msk [vmem:[%s1295_s1 + $0x5a] sm:$0x2] %vm8_vm0, %v222_v27  }
  0xb2   :  { %571 = vst.msk [vmem:[%s1295_s1 + $0x1c] sm:$0x1] %vm8_vm0, %v230_v28   ;;  %572 = vst.msk [vmem:[%s1295_s1 + $0x5b] sm:$0x2] %vm8_vm0, %v230_v28  }
  0xb4   :  { %v238_v29 = vpop.permute.xlu0 %237  }
  0xb5   :  { %v246_v30 = vpop.permute.xlu1 %245   ;;  %573 = vst.msk [vmem:[%s1295_s1 + $0x1d] sm:$0x1] %vm8_vm0, %v238_v29   ;;  %574 = vst.msk [vmem:[%s1295_s1 + $0x5c] sm:$0x2] %vm8_vm0, %v238_v29  }
  0xb6   :  { %575 = vst.msk [vmem:[%s1295_s1 + $0x1e] sm:$0x1] %vm8_vm0, %v246_v30   ;;  %576 = vst.msk [vmem:[%s1295_s1 + $0x5d] sm:$0x2] %vm8_vm0, %v246_v30  }
  0xb8   :  { %v254_v31 = vpop.permute.xlu0 %253  }
  0xb9   :  { %v262_v32 = vpop.permute.xlu1 %261   ;;  %577 = vst.msk [vmem:[%s1295_s1 + $0x1f] sm:$0x1] %vm8_vm0, %v254_v31   ;;  %578 = vst.msk [vmem:[%s1295_s1 + $0x5e] sm:$0x2] %vm8_vm0, %v254_v31  }
  0xba   :  { %579 = vst.msk [vmem:[%s1295_s1 + $0x20] sm:$0x1] %vm8_vm0, %v262_v32   ;;  %580 = vst.msk [vmem:[%s1295_s1 + $0x5f] sm:$0x2] %vm8_vm0, %v262_v32  }
  0xbc   :  { %v270_v33 = vpop.permute.xlu0 %269  }
  0xbd   :  { %v278_v34 = vpop.permute.xlu1 %277   ;;  %581 = vst.msk [vmem:[%s1295_s1 + $0x21] sm:$0x1] %vm8_vm0, %v270_v33   ;;  %582 = vst.msk [vmem:[%s1295_s1 + $0x60] sm:$0x2] %vm8_vm0, %v270_v33  }
  0xbe   :  { %583 = vst.msk [vmem:[%s1295_s1 + $0x22] sm:$0x1] %vm8_vm0, %v278_v34   ;;  %584 = vst.msk [vmem:[%s1295_s1 + $0x61] sm:$0x2] %vm8_vm0, %v278_v34  }
  0xc0   :  { %v286_v35 = vpop.permute.xlu0 %285  }
  0xc1   :  { %v294_v36 = vpop.permute.xlu1 %293   ;;  %585 = vst.msk [vmem:[%s1295_s1 + $0x23] sm:$0x1] %vm8_vm0, %v286_v35   ;;  %586 = vst.msk [vmem:[%s1295_s1 + $0x62] sm:$0x2] %vm8_vm0, %v286_v35  }
  0xc2   :  { %587 = vst.msk [vmem:[%s1295_s1 + $0x24] sm:$0x1] %vm8_vm0, %v294_v36   ;;  %588 = vst.msk [vmem:[%s1295_s1 + $0x63] sm:$0x2] %vm8_vm0, %v294_v36  }
  0xc4   :  { %v302_v37 = vpop.permute.xlu0 %301  }
  0xc5   :  { %v310_v38 = vpop.permute.xlu1 %309   ;;  %589 = vst.msk [vmem:[%s1295_s1 + $0x25] sm:$0x1] %vm8_vm0, %v302_v37   ;;  %590 = vst.msk [vmem:[%s1295_s1 + $0x64] sm:$0x2] %vm8_vm0, %v302_v37  }
  0xc6   :  { %591 = vst.msk [vmem:[%s1295_s1 + $0x26] sm:$0x1] %vm8_vm0, %v310_v38   ;;  %592 = vst.msk [vmem:[%s1295_s1 + $0x65] sm:$0x2] %vm8_vm0, %v310_v38  }
  0xc8   :  { %v318_v39 = vpop.permute.xlu0 %317  }
  0xc9   :  { %v326_v40 = vpop.permute.xlu1 %325   ;;  %593 = vst.msk [vmem:[%s1295_s1 + $0x27] sm:$0x1] %vm8_vm0, %v318_v39   ;;  %594 = vst.msk [vmem:[%s1295_s1 + $0x66] sm:$0x2] %vm8_vm0, %v318_v39  }
  0xca   :  { %595 = vst.msk [vmem:[%s1295_s1 + $0x28] sm:$0x1] %vm8_vm0, %v326_v40   ;;  %596 = vst.msk [vmem:[%s1295_s1 + $0x67] sm:$0x2] %vm8_vm0, %v326_v40  }
  0xcc   :  { %v334_v41 = vpop.permute.xlu0 %333  }
  0xcd   :  { %v342_v42 = vpop.permute.xlu1 %341   ;;  %597 = vst.msk [vmem:[%s1295_s1 + $0x29] sm:$0x1] %vm8_vm0, %v334_v41   ;;  %598 = vst.msk [vmem:[%s1295_s1 + $0x68] sm:$0x2] %vm8_vm0, %v334_v41  }
  0xce   :  { %599 = vst.msk [vmem:[%s1295_s1 + $0x2a] sm:$0x1] %vm8_vm0, %v342_v42   ;;  %600 = vst.msk [vmem:[%s1295_s1 + $0x69] sm:$0x2] %vm8_vm0, %v342_v42  }
  0xd0   :  { %v350_v43 = vpop.permute.xlu0 %349  }
  0xd1   :  { %v358_v44 = vpop.permute.xlu1 %357   ;;  %601 = vst.msk [vmem:[%s1295_s1 + $0x2b] sm:$0x1] %vm8_vm0, %v350_v43   ;;  %602 = vst.msk [vmem:[%s1295_s1 + $0x6a] sm:$0x2] %vm8_vm0, %v350_v43  }
  0xd2   :  { %603 = vst.msk [vmem:[%s1295_s1 + $0x2c] sm:$0x1] %vm8_vm0, %v358_v44   ;;  %604 = vst.msk [vmem:[%s1295_s1 + $0x6b] sm:$0x2] %vm8_vm0, %v358_v44  }
  0xd4   :  { %v366_v45 = vpop.permute.xlu0 %365  }
  0xd5   :  { %v374_v46 = vpop.permute.xlu1 %373   ;;  %605 = vst.msk [vmem:[%s1295_s1 + $0x2d] sm:$0x1] %vm8_vm0, %v366_v45   ;;  %606 = vst.msk [vmem:[%s1295_s1 + $0x6c] sm:$0x2] %vm8_vm0, %v366_v45  }
  0xd6   :  { %607 = vst.msk [vmem:[%s1295_s1 + $0x2e] sm:$0x1] %vm8_vm0, %v374_v46   ;;  %608 = vst.msk [vmem:[%s1295_s1 + $0x6d] sm:$0x2] %vm8_vm0, %v374_v46  }
  0xd8   :  { %v382_v47 = vpop.permute.xlu0 %381  }
  0xd9   :  { %v390_v48 = vpop.permute.xlu1 %389   ;;  %609 = vst.msk [vmem:[%s1295_s1 + $0x2f] sm:$0x1] %vm8_vm0, %v382_v47   ;;  %610 = vst.msk [vmem:[%s1295_s1 + $0x6e] sm:$0x2] %vm8_vm0, %v382_v47  }
  0xda   :  { %611 = vst.msk [vmem:[%s1295_s1 + $0x30] sm:$0x1] %vm8_vm0, %v390_v48   ;;  %612 = vst.msk [vmem:[%s1295_s1 + $0x6f] sm:$0x2] %vm8_vm0, %v390_v48  }
  0xdc   :  { %v398_v49 = vpop.permute.xlu0 %397  }
  0xdd   :  { %v406_v50 = vpop.permute.xlu1 %405   ;;  %613 = vst.msk [vmem:[%s1295_s1 + $0x31] sm:$0x1] %vm8_vm0, %v398_v49   ;;  %614 = vst.msk [vmem:[%s1295_s1 + $0x70] sm:$0x2] %vm8_vm0, %v398_v49  }
  0xde   :  { %615 = vst.msk [vmem:[%s1295_s1 + $0x32] sm:$0x1] %vm8_vm0, %v406_v50   ;;  %616 = vst.msk [vmem:[%s1295_s1 + $0x71] sm:$0x2] %vm8_vm0, %v406_v50  }
  0xe0   :  { %v414_v51 = vpop.permute.xlu0 %413  }
  0xe1   :  { %v422_v52 = vpop.permute.xlu1 %421   ;;  %617 = vst.msk [vmem:[%s1295_s1 + $0x33] sm:$0x1] %vm8_vm0, %v414_v51   ;;  %618 = vst.msk [vmem:[%s1295_s1 + $0x72] sm:$0x2] %vm8_vm0, %v414_v51  }
  0xe2   :  { %619 = vst.msk [vmem:[%s1295_s1 + $0x34] sm:$0x1] %vm8_vm0, %v422_v52   ;;  %620 = vst.msk [vmem:[%s1295_s1 + $0x73] sm:$0x2] %vm8_vm0, %v422_v52  }
  0xe4   :  { %v430_v53 = vpop.permute.xlu0 %429  }
  0xe5   :  { %v438_v54 = vpop.permute.xlu1 %437   ;;  %621 = vst.msk [vmem:[%s1295_s1 + $0x35] sm:$0x1] %vm8_vm0, %v430_v53   ;;  %622 = vst.msk [vmem:[%s1295_s1 + $0x74] sm:$0x2] %vm8_vm0, %v430_v53  }
  0xe6   :  { %623 = vst.msk [vmem:[%s1295_s1 + $0x36] sm:$0x1] %vm8_vm0, %v438_v54   ;;  %624 = vst.msk [vmem:[%s1295_s1 + $0x75] sm:$0x2] %vm8_vm0, %v438_v54  }
  0xe8   :  { %v446_v55 = vpop.permute.xlu0 %445  }
  0xe9   :  { %v454_v56 = vpop.permute.xlu1 %453   ;;  %625 = vst.msk [vmem:[%s1295_s1 + $0x37] sm:$0x1] %vm8_vm0, %v446_v55   ;;  %626 = vst.msk [vmem:[%s1295_s1 + $0x76] sm:$0x2] %vm8_vm0, %v446_v55  }
  0xea   :  { %627 = vst.msk [vmem:[%s1295_s1 + $0x38] sm:$0x1] %vm8_vm0, %v454_v56   ;;  %628 = vst.msk [vmem:[%s1295_s1 + $0x77] sm:$0x2] %vm8_vm0, %v454_v56  }
  0xec   :  { %v462_v57 = vpop.permute.xlu0 %461  }
  0xed   :  { %v470_v58 = vpop.permute.xlu1 %469   ;;  %629 = vst.msk [vmem:[%s1295_s1 + $0x39] sm:$0x1] %vm8_vm0, %v462_v57   ;;  %630 = vst.msk [vmem:[%s1295_s1 + $0x78] sm:$0x2] %vm8_vm0, %v462_v57  }
  0xee   :  { %631 = vst.msk [vmem:[%s1295_s1 + $0x3a] sm:$0x1] %vm8_vm0, %v470_v58   ;;  %632 = vst.msk [vmem:[%s1295_s1 + $0x79] sm:$0x2] %vm8_vm0, %v470_v58  }
  0xf0   :  { %v478_v59 = vpop.permute.xlu0 %477  }
  0xf1   :  { %v486_v60 = vpop.permute.xlu1 %485   ;;  %633 = vst.msk [vmem:[%s1295_s1 + $0x3b] sm:$0x1] %vm8_vm0, %v478_v59   ;;  %634 = vst.msk [vmem:[%s1295_s1 + $0x7a] sm:$0x2] %vm8_vm0, %v478_v59  }
  0xf2   :  { %635 = vst.msk [vmem:[%s1295_s1 + $0x3c] sm:$0x1] %vm8_vm0, %v486_v60   ;;  %636 = vst.msk [vmem:[%s1295_s1 + $0x7b] sm:$0x2] %vm8_vm0, %v486_v60  }
  0xf4   :  { %v494_v61 = vpop.permute.xlu0 %493  }
  0xf5   :  { %v502_v62 = vpop.permute.xlu1 %501   ;;  %637 = vst.msk [vmem:[%s1295_s1 + $0x3d] sm:$0x1] %vm8_vm0, %v494_v61   ;;  %638 = vst.msk [vmem:[%s1295_s1 + $0x7c] sm:$0x2] %vm8_vm0, %v494_v61  }
  0xf6   :  { %639 = vst.msk [vmem:[%s1295_s1 + $0x3e] sm:$0x1] %vm8_vm0, %v502_v62   ;;  %640 = vst.msk [vmem:[%s1295_s1 + $0x7d] sm:$0x2] %vm8_vm0, %v502_v62  }
  0xf8   :  { %v510_v63 = vpop.permute.xlu0 %509  }
  0xf9   :  { %641 = vst.msk [vmem:[%s1295_s1 + $0x3f] sm:$0x1] %vm8_vm0, %v510_v63   ;;  %642 = vst.msk [vmem:[%s1295_s1 + $0x7e] sm:$0x2] %vm8_vm0, %v510_v63  }

// kernel: audio_feature_extractor.1
= control target key start
LH: loop header
LB: loop body
LE: loop exit
PB: predicated region body
PF: predicated region fallthrough
CT: control target
= control target key end

     0   :  { %s1833_s21 = smov 0   ;;  %s1835_s22 = smov 0   ;;  %s2590_s0 = inlined_call_operand.vmem [shape: f32[2,16,264], index: 0, kind: input, shape index: {}]   ;;  %s2591_s1 = inlined_call_operand.vmem [shape: f32[128,16], index: 1, kind: input, shape index: {}]   ;;  %s2592_s2 = inlined_call_operand.vmem [shape: f32[128,96], index: 2, kind: input, shape index: {}]   ;;  %s2593_s3 = inlined_call_operand.vmem [shape: f32[128,1], index: 3, kind: input, shape index: {}]   ;;  %s2594_s4 = inlined_call_operand.vmem [shape: f32[128,128], index: 4, kind: input, shape index: {}]   ;;  %s2595_s5 = inlined_call_operand.vmem [shape: f32[128,1], index: 5, kind: input, shape index: {}]   ;;  %s2596_s6 = inlined_call_operand.vmem [shape: f32[2,64,256], index: 6, kind: output, shape index: {}]  }
   0x1   :  { %s1837_s23 = smov 0   ;;  %s1839_s24 = smov 0  }
   0x2   :  { %s1841_s25 = smov 0   ;;  %s1843_s26 = smov 0  }
   0x3   :  { %s1845_s27 = smov 0  }
   0x4 LB: > { %s25_s28 = sadd.s32 1, %s1784_s25  ;;  %s28_s29 = sadd.s32 1, %s1788_s26  ;;  %s1792_s27 = sphi %s1845_s27, %s16_s27   ;;  %s1788_s26 = sphi %s1843_s26, %s2607_s26   ;;  %s1784_s25 = sphi %s1841_s25, %s2606_s25   ;;  %s1780_s24 = sphi %s1839_s24, %s2605_s24   ;;  %s1776_s23 = sphi %s1837_s23, %s2604_s23   ;;  %s1772_s22 = sphi %s1835_s22, %s2603_s22   ;;  %s1768_s21 = sphi %s1833_s21, %s2602_s21  }
   0x5   : > { %p26_p0 = scmp.ge.s32.totalorder %s25_s28, 2  ;;  %s1617_s30 = sadd.s32 4294967295, %s1792_s27  }
   0x6   : > { %p178_p1 = scmp.ne.s32.totalorder %s1772_s22, %s1768_s21  ;;  %p179_p2 = scmp.eq.s32.totalorder %s1617_s30, 3 }
   0x7   : > { %s2609_s28 = smov (%p26_p0, %s25_s28), 0  ;;  %s2611_s29 = smov (!%p26_p0, %s28_s29), %s1788_s26 }
   0x8   : > { %s164_s7 = ssub.s32 %s1784_s25, %s2609_s28  ;;  %p30_p3 = scmp.ge.s32.totalorder %s2611_s29, 2 }
   0x9   : > { %p1621_p4 = scmp.ge.s32.totalorder %s1792_s27, 1  ;;  %p1879_p5 = por %p179_p2, %p178_p1 }
   0xa   : > { %p226_p6 = scmp.lt.s32.totalorder %s1792_s27, 5  ;;  %s2613_s29 = smov (%p30_p3, %s2611_s29), 0 }
   0xb   : > { %s163_s9 = ssub.s32 %s1788_s26, %s2613_s29  ;;  %s168_s11 = sadd.s32 1, %s1772_s22 }
   0xc   : > { %p227_p7 = pnand %p1621_p4, %p226_p6  ;;  %s165_s10 = sor.u32 %s164_s7, %s163_s9 }
   0xd   : > { %p166_p8 = scmp.eq.s32.totalorder %s165_s10, 0  ;;  %p255_p9 = scmp.lt.s32.totalorder (!%p227_p7), %s1780_s24, 1 }
   0xe   : > { %230 = sbr.rel (%p227_p7) target bundleno = 1183 (0x49f), region = 44  ;;  %s1624_s13 = sshll.u32 (!%p227_p7), %s1776_s23, 7 }
   0xf   : > { %s1890_s12 = scalar_select %p166_p8, %s1772_s22, %s168_s11  }
  0x10   : > { %s261_s14 = sshra.s32 (!%p227_p7), %s1624_s13, 7  ;;  %s1795_s18 = smov (!%p227_p7), 126  }
  0x11   : > { %s1625_s17 = sshll.u32 (!%p227_p7), %s261_s14, 3  ;;  %s1796_s19 = smov (!%p227_p7), 127  }
  0x12   : > { %s972_s10 = sadd.s32 (!%p227_p7), 4294967293, %s1624_s13 }
  0x13   : > { %v1794_v0 = vmov 0.0   ;;  %s256_s15 = scalar_select %p255_p9, %s1780_s24, 1  ;;  %v269_v5 = vld [vmem:[%s2591_s1] sm:$0xff]  ;;  %vm285_vm0 = vcmask 130048   ;;  %v270_v7 = vld [vmem:[%s2591_s1 + $0x8] sm:$0xff]  ;;  %v271_v9 = vld [vmem:[%s2591_s1 + $0x10] sm:$0xff] }
  0x14   : > { %398 = vmatprep.mubr.f32.mxu0 %v1794_v0  ;;  %446 = vmatprep.mubr.f32.mxu1 %v1794_v0  ;;  %v277_v6 = vld [vmem:[%s2591_s1 + $0x40] sm:$0xff]  ;;  %v278_v8 = vld [vmem:[%s2591_s1 + $0x48] sm:$0xff]  ;;  %v279_v10 = vld [vmem:[%s2591_s1 + $0x50] sm:$0xff]  ;;  %vm608_vm1 = vcmask 1031168   ;;  %vm575_vm2 = vcmask 1039360   ;;  %vm727_vm3 = vcmask 785408  }
  0x15   : > { %s1675_s16 = smul.u32 48, %s256_s15  ;;  %v272_v11 = vld [vmem:[%s2591_s1 + $0x18] sm:$0xff]  ;;  %v273_v13 = vld [vmem:[%s2591_s1 + $0x20] sm:$0xff]  ;;  %v274_v15 = vld [vmem:[%s2591_s1 + $0x28] sm:$0xff] }
  0x16   : > { %v280_v12 = vld [vmem:[%s2591_s1 + $0x58] sm:$0xff]  ;;  %v281_v14 = vld [vmem:[%s2591_s1 + $0x60] sm:$0xff]  ;;  %v282_v16 = vld [vmem:[%s2591_s1 + $0x68] sm:$0xff] }
  0x17   : > { %s259_s20 = scalar_lea.vmem %s2590_s0, %s1675_s16  ;;  %v275_v17 = vld [vmem:[%s2591_s1 + $0x30] sm:$0xff]  ;;  %v276_v19 = vld [vmem:[%s2591_s1 + $0x38] sm:$0xff]  ;;  %s252_s16 = sand.u32 1, %s1768_s21  }
  0x18   : > { %s264_s30 = scalar_lea.vmem %s259_s20, %s1625_s17  ;;  %v283_v18 = vld [vmem:[%s2591_s1 + $0x70] sm:$0xff]  ;;  %v284_v20 = vld [vmem:[%s2591_s1 + $0x78] sm:$0xff]  ;;  %s1622_s17 = sshll.u32 %s252_s16, 6 }
  0x19   : > { %v268_v1 = vld [vmem:[%s264_s30 + $0x20] sm:$0xff]  ;;  %v267_v2 = vld [vmem:[%s264_s30 + $0x18] sm:$0xff]  ;;  %v266_v3 = vld [vmem:[%s264_s30 + $0x8] sm:$0xff]  ;;  %s2537_s20 = scalar_lea.vmem [#allocation2], %s1622_s17  ;;  %s1667_s21 = sshll.u32 (%p1879_p5), %s1780_s24, 4 }
  0x1a   : > { %362 = vmatprep.subr.mxu0 %v268_v1  ;;  %1671 = vmatprep.subr.mxu1 %v268_v1  ;;  %v265_v4 = vld [vmem:[%s264_s30] sm:$0xff] }
  0x1b   : > { %363 = vmatpush1.msra.mxu0 %v267_v2  ;;  %1673 = vmatpush1.msra.mxu1 %v267_v2 }
  0x1c   : > { %364 = vmatprep.subr.mxu0 %v266_v3  ;;  %1672 = vmatprep.subr.mxu1 %v266_v3 }
  0x1d   : > { %365 = vmatpush1.msra.mxu0 %v265_v4  ;;  %1674 = vmatpush1.msra.mxu1 %v265_v4 }
  0x1e   : > { %1626 = vmatmul.mubr.msk.f32.vlgmr.msra.gmra.mxu0 %vm285_vm0, %v269_v5  ;;  %1634 = vmatmul.mubr.msk.f32.vlgmr.msra.gmra.mxu1 %vm285_vm0, %v277_v6 }
  0x1f   : > { %404 = vmatprep.mubr.f32.mxu0 %v1794_v0  ;;  %452 = vmatprep.mubr.f32.mxu1 %v1794_v0 }
  0x22   : > { %1627 = vmatmul.mubr.msk.f32.gmra.mxu0 %vm285_vm0, %v270_v7  ;;  %1635 = vmatmul.mubr.msk.f32.gmra.mxu1 %vm285_vm0, %v278_v8 }
  0x23   : > { %410 = vmatprep.mubr.f32.mxu0 %v1794_v0  ;;  %458 = vmatprep.mubr.f32.mxu1 %v1794_v0 }
  0x26   : > { %1628 = vmatmul.mubr.msk.f32.gmra.mxu0 %vm285_vm0, %v271_v9  ;;  %1636 = vmatmul.mubr.msk.f32.gmra.mxu1 %vm285_vm0, %v279_v10 }
  0x27   : > { %416 = vmatprep.mubr.f32.mxu0 %v1794_v0  ;;  %464 = vmatprep.mubr.f32.mxu1 %v1794_v0 }
  0x2a   : > { %1629 = vmatmul.mubr.msk.f32.gmra.mxu0 %vm285_vm0, %v272_v11  ;;  %1637 = vmatmul.mubr.msk.f32.gmra.mxu1 %vm285_vm0, %v280_v12 }
  0x2b   : > { %422 = vmatprep.mubr.f32.mxu0 %v1794_v0  ;;  %470 = vmatprep.mubr.f32.mxu1 %v1794_v0 }
  0x2e   : > { %1630 = vmatmul.mubr.msk.f32.gmra.mxu0 %vm285_vm0, %v273_v13  ;;  %1638 = vmatmul.mubr.msk.f32.gmra.mxu1 %vm285_vm0, %v281_v14 }
  0x2f   : > { %428 = vmatprep.mubr.f32.mxu0 %v1794_v0  ;;  %476 = vmatprep.mubr.f32.mxu1 %v1794_v0 }
  0x32   : > { %1631 = vmatmul.mubr.msk.f32.gmra.mxu0 %vm285_vm0, %v274_v15  ;;  %1639 = vmatmul.mubr.msk.f32.gmra.mxu1 %vm285_vm0, %v282_v16 }
  0x33   : > { %434 = vmatprep.mubr.f32.mxu0 %v1794_v0  ;;  %482 = vmatprep.mubr.f32.mxu1 %v1794_v0 }
  0x36   : > { %1632 = vmatmul.mubr.msk.f32.gmra.mxu0 %vm285_vm0, %v275_v17  ;;  %1640 = vmatmul.mubr.msk.f32.gmra.mxu1 %vm285_vm0, %v283_v18 }
  0x37   : > { %440 = vmatprep.mubr.f32.mxu0 %v1794_v0  ;;  %488 = vmatprep.mubr.f32.mxu1 %v1794_v0 }
  0x3a   : > { %1633 = vmatmul.mubr.msk.f32.gmra.mxu0 %vm285_vm0, %v276_v19  ;;  %1641 = vmatmul.mubr.msk.f32.gmra.mxu1 %vm285_vm0, %v284_v20 }
  0x3b   : > { %840 = vmatprep.mubr.f32.mxu1 %v1794_v0  ;;  %1278 = vmatprep.mubr.f32.mxu0 %v1794_v0 }
  0xde   : > { %v400_v21 = vpop.f32.mrf.mxu0  ;;  %v448_v22 = vpop.f32.mrf.mxu1 }
  0xdf   : > { %v495_v23 = vmax.f32 %v400_v21, %v448_v22  ;;  %v1797_v22 = vmov 0  }
  0xe0   : > { %v402_v24 = vpop.f32.mrf.mxu0  ;;  %v450_v25 = vpop.f32.mrf.mxu1  ;;  %1737 = vset.pattern.permute.xlu1 %v1797_v22  ;;  %1736 = vset.pattern.permute.xlu0 %v1797_v22 }
  0xe1   : > { %v1982_v26 = vmax.f32 %v495_v23, 0.0  ;;  %v496_v27 = vmax.f32 %v402_v24, %v450_v25  ;;  %v642_v23 = vld [vmem:[%s2593_s3 + $0x58] sm:$0xff]  ;;  %v633_v24 = vld [vmem:[%s2593_s3 + $0x10] sm:$0xff] }
  0xe2   : > { %v406_v28 = vpop.f32.mrf.mxu0  ;;  %v454_v29 = vpop.f32.mrf.mxu1  ;;  %v634_v25 = vld [vmem:[%s2593_s3 + $0x18] sm:$0xff] }
  0xe3   : > { %v497_v30 = vmax.f32 %v406_v28, %v454_v29  ;;  %600 = vrot.lane.b32.xlu1 %v1982_v26, %s1795_s18  ;;  %v1986_v33 = vmax.f32 %v496_v27, 0.0  ;;  %v641_v27 = vld [vmem:[%s2593_s3 + $0x50] sm:$0xff]  ;;  %v631_v28 = vld [vmem:[%s2593_s3] sm:$0xff]  ;;  %v640_v29 = vld [vmem:[%s2593_s3 + $0x48] sm:$0xff] }
  0xe4   : > { %v408_v31 = vpop.f32.mrf.mxu0  ;;  %v456_v32 = vpop.f32.mrf.mxu1 }
  0xe5   : > { %v1988_v34 = vmax.f32 %v497_v30, 0.0  ;;  %v498_v35 = vmax.f32 %v408_v31, %v456_v32  ;;  %v638_v30 = vld [vmem:[%s2593_s3 + $0x38] sm:$0xff]  ;;  %v639_v31 = vld [vmem:[%s2593_s3 + $0x40] sm:$0xff]  ;;  %v637_v32 = vld [vmem:[%s2593_s3 + $0x30] sm:$0xff] }
  0xe6   : > { %v412_v36 = vpop.f32.mrf.mxu0  ;;  %v460_v37 = vpop.f32.mrf.mxu1 }
  0xe7   : > { %602 = vrot.lane.b32.xlu1 %v1986_v33, %s1795_s18  ;;  %604 = vrot.lane.b32.xlu0 %v1988_v34, %s1795_s18  ;;  %v514_v40 = vmax.f32 %v498_v35, 0.0  ;;  %v499_v16 = vmax.f32 %v412_v36, %v460_v37  ;;  %v636_v35 = vld [vmem:[%s2593_s3 + $0x28] sm:$0xff]  ;;  %v645_v36 = vld [vmem:[%s2593_s3 + $0x70] sm:$0xff] }
  0xe8   : > { %v414_v38 = vpop.f32.mrf.mxu0  ;;  %v462_v39 = vpop.f32.mrf.mxu1 }
  0xe9   : > { %v500_v18 = vmax.f32 %v414_v38, %v462_v39  ;;  %v515_v20 = vmax.f32 %v499_v16, 0.0  ;;  %v635_v38 = vld [vmem:[%s2593_s3 + $0x20] sm:$0xff]  ;;  %v625_v16 = vld [vmem:[%s2592_s2 + $0x50] sm:$0xff] }
  0xea   : > { %v418_v41 = vpop.f32.mrf.mxu0  ;;  %v466_v42 = vpop.f32.mrf.mxu1 }
  0xeb   : > { %606 = vrot.lane.b32.xlu0 %v514_v40, %s1795_s18  ;;  %v501_v11 = vmax.f32 %v418_v41, %v466_v42  ;;  %v516_v21 = vmax.f32 %v500_v18, 0.0  ;;  %v644_v41 = vld [vmem:[%s2593_s3 + $0x68] sm:$0xff]  ;;  %v627_v18 = vld [vmem:[%s2592_s2 + $0x60] sm:$0xff] }
  0xec   : > { %v420_v43 = vpop.f32.mrf.mxu0  ;;  %v468_v44 = vpop.f32.mrf.mxu1 }
  0xed   : > { %v502_v14 = vmax.f32 %v420_v43, %v468_v44  ;;  %v517_v17 = vmax.f32 %v501_v11, 0.0  ;;  %v643_v44 = vld [vmem:[%s2593_s3 + $0x60] sm:$0xff]  ;;  %v620_v11 = vld [vmem:[%s2592_s2 + $0x28] sm:$0xff] }
  0xee   : > { %v424_v45 = vpop.f32.mrf.mxu0  ;;  %v472_v46 = vpop.f32.mrf.mxu1 }
  0xef   : > { %v503_v47 = vmax.f32 %v424_v45, %v472_v46  ;;  %v518_v19 = vmax.f32 %v502_v14, 0.0  ;;  %v623_v14 = vld [vmem:[%s2592_s2 + $0x40] sm:$0xff] }
  0xf0   : > { %v426_v48 = vpop.f32.mrf.mxu0  ;;  %v474_v49 = vpop.f32.mrf.mxu1 }
  0xf1   : > { %v519_v50 = vmax.f32 %v503_v47, 0.0  ;;  %v504_v51 = vmax.f32 %v426_v48, %v474_v49 }
  0xf2   : > { %v430_v52 = vpop.f32.mrf.mxu0  ;;  %v478_v53 = vpop.f32.mrf.mxu1 }
  0xf3   : > { %v520_v54 = vmax.f32 %v504_v51, 0.0  ;;  %v505_v55 = vmax.f32 %v430_v52, %v478_v53  ;;  %559 = vrot.lane.b32.xlu0 %v519_v50, %s1796_s19 }
  0xf4   : > { %v432_v56 = vpop.f32.mrf.mxu0  ;;  %v480_v57 = vpop.f32.mrf.mxu1 }
  0xf5   : > { %v521_v58 = vmax.f32 %v505_v55, 0.0  ;;  %v506_v59 = vmax.f32 %v432_v56, %v480_v57  ;;  %561 = vrot.lane.b32.xlu1 %v520_v54, %s1796_s19 }
  0xf6   : > { %v436_v60 = vpop.f32.mrf.mxu0  ;;  %v484_v61 = vpop.f32.mrf.mxu1 }
  0xf7   : > { %v522_v62 = vmax.f32 %v506_v59, 0.0  ;;  %v507_v63 = vmax.f32 %v436_v60, %v484_v61  ;;  %563 = vrot.lane.b32.xlu0 %v521_v58, %s1796_s19 }
  0xf8   : > { %v438_v1 = vpop.f32.mrf.mxu0  ;;  %v486_v2 = vpop.f32.mrf.mxu1 }
  0xf9   : > { %v1998_v3 = vmax.f32 %v507_v63, 0.0  ;;  %v508_v4 = vmax.f32 %v438_v1, %v486_v2  ;;  %565 = vrot.lane.b32.xlu1 %v522_v62, %s1796_s19 }
  0xfa   : > { %v442_v5 = vpop.f32.mrf.mxu0  ;;  %v490_v6 = vpop.f32.mrf.mxu1 }
  0xfb   : > { %v2001_v7 = vmax.f32 %v508_v4, 0.0  ;;  %v509_v8 = vmax.f32 %v442_v5, %v490_v6  ;;  %567 = vrot.lane.b32.xlu0 %v1998_v3, %s1796_s19 }
  0xfc   : > { %v444_v9 = vpop.f32.mrf.mxu0  ;;  %v492_v10 = vpop.f32.mrf.mxu1 }
  0xfd   : > { %v2005_v12 = vmax.f32 %v509_v8, 0.0  ;;  %v510_v13 = vmax.f32 %v444_v9, %v492_v10  ;;  %569 = vrot.lane.b32.xlu1 %v2001_v7, %s1796_s19  ;;  %v615_v8 = vld [vmem:[%s2592_s2] sm:$0xff]  ;;  %v616_v9 = vld [vmem:[%s2592_s2 + $0x8] sm:$0xff]  ;;  %v617_v10 = vld [vmem:[%s2592_s2 + $0x10] sm:$0xff] }
  0xff   : > { %v2009_v15 = vmax.f32 %v510_v13, 0.0  ;;  %571 = vrot.lane.b32.xlu0 %v2005_v12, %s1796_s19  ;;  %v622_v13 = vld [vmem:[%s2592_s2 + $0x38] sm:$0xff] }
 0x101   : > { %573 = vrot.lane.b32.xlu1 %v2009_v15, %s1796_s19 }
 0x103   : > { %555 = vrot.lane.b32.xlu0 %v517_v17, %s1796_s19  ;;  %v626_v17 = vld [vmem:[%s2592_s2 + $0x58] sm:$0xff] }
 0x105   : > { %557 = vrot.lane.b32.xlu1 %v518_v19, %s1796_s19  ;;  %v628_v19 = vld [vmem:[%s2592_s2 + $0x68] sm:$0xff] }
 0x107   : > { %551 = vrot.lane.b32.xlu0 %v515_v20, %s1796_s19  ;;  %v629_v20 = vld [vmem:[%s2592_s2 + $0x70] sm:$0xff] }
 0x109   : > { %553 = vrot.lane.b32.xlu1 %v516_v21, %s1796_s19  ;;  %v630_v21 = vld [vmem:[%s2592_s2 + $0x78] sm:$0xff] }
 0x10b   : > { %547 = vrot.lane.b32.xlu0 %v1988_v34, %s1796_s19 }
 0x10d   : > { %549 = vrot.lane.b32.xlu1 %v514_v40, %s1796_s19 }
 0x10f   : > { %543 = vrot.lane.b32.xlu0 %v1982_v26, %s1796_s19  ;;  %v632_v26 = vld [vmem:[%s2593_s3 + $0x8] sm:$0xff] }
 0x111   : > { %545 = vrot.lane.b32.xlu1 %v1986_v33, %s1796_s19  ;;  %v646_v33 = vld [vmem:[%s2593_s3 + $0x78] sm:$0xff] }
 0x113   : > { %664 = vperm.xlu0 %1736, %v634_v25  }
 0x115   : > { %704 = vperm.xlu1 %1737, %v642_v23  }
 0x117   : > { %699 = vperm.xlu0 %1736, %v641_v27  }
 0x119   : > { %659 = vperm.xlu1 %1737, %v633_v24  }
 0x11b   : > { %694 = vperm.xlu0 %1736, %v640_v29  }
 0x11d   : > { %654 = vperm.xlu1 %1737, %v632_v26  }
 0x11f   : > { %689 = vperm.xlu0 %1736, %v639_v31  }
 0x121   : > { %649 = vperm.xlu1 %1737, %v631_v28  }
 0x123   : > { %724 = vperm.xlu0 %1736, %v646_v33  }
 0x125   : > { %684 = vperm.xlu1 %1737, %v638_v30  }
 0x127   : > { %719 = vperm.xlu0 %1736, %v645_v36   ;;  %v969_v36 = vlaneseq }
 0x129   : > { %679 = vperm.xlu1 %1737, %v637_v32  }
 0x12b   : > { %714 = vperm.xlu0 %1736, %v644_v41   ;;  %v970_v41 = vand.u32 127, %v969_v36 }
 0x12d   : > { %674 = vperm.xlu1 %1737, %v636_v35  }
 0x12f   : > { %709 = vperm.xlu0 %1736, %v643_v44  }
 0x131   : > { %669 = vperm.xlu1 %1737, %v635_v38  }
 0x155   : > { %v601_v34 = vpop.permute.xlu1 %600 }
 0x159   : > { %v605_v37 = vpop.permute.xlu0 %604  ;;  %v603_v39 = vpop.permute.xlu1 %602 }
 0x15a   : > { %v609_v43 = vsel %vm608_vm1, %v601_v34, %v603_v39 }
 0x15d   : > { %v607_v40 = vpop.permute.xlu0 %606 }
 0x15e   : > { %v610_v42 = vsel %vm608_vm1, %v605_v37, %v607_v40  ;;  %784 = vmatprep.subr.mxu1 %v607_v40 }
 0x15f   : > { %785 = vmatpush1.msra.mxu1 %v610_v42 }
 0x160   : > { %786 = vmatprep.subr.mxu1 %v603_v39 }
 0x161   : > { %787 = vmatpush1.msra.mxu1 %v609_v43 }
 0x165   : > { %v560_v45 = vpop.permute.xlu0 %559 }
 0x167   : > { %v562_v46 = vpop.permute.xlu1 %561 }
 0x168   : > { %v580_v59 = vsel %vm575_vm2, %v560_v45, %v562_v46  ;;  %v971_v45 = vadd.s32 128, %v970_v41 }
 0x169   : > { %v564_v47 = vpop.permute.xlu0 %563 }
 0x16b   : > { %v566_v48 = vpop.permute.xlu1 %565 }
 0x16c   : > { %v581_v57 = vsel %vm575_vm2, %v564_v47, %v566_v48 }
 0x16d   : > { %v568_v49 = vpop.permute.xlu0 %567 }
 0x16f   : > { %v570_v50 = vpop.permute.xlu1 %569 }
 0x170   : > { %v582_v55 = vsel %vm575_vm2, %v568_v49, %v570_v50 }
 0x171   : > { %v572_v51 = vpop.permute.xlu0 %571 }
 0x173   : > { %v574_v52 = vpop.permute.xlu1 %573 }
 0x174   : > { %v583_v53 = vsel %vm575_vm2, %v572_v51, %v574_v52  ;;  %788 = vmatprep.subr.mxu1 %v574_v52 }
 0x175   : > { %v556_v54 = vpop.permute.xlu0 %555  ;;  %789 = vmatpush1.msra.mxu1 %v583_v53 }
 0x176   : > { %790 = vmatprep.subr.mxu1 %v570_v50 }
 0x177   : > { %791 = vmatpush1.msra.mxu1 %v582_v55  ;;  %v558_v56 = vpop.permute.xlu1 %557 }
 0x178   : > { %792 = vmatprep.subr.mxu1 %v566_v48  ;;  %v579_v61 = vsel %vm575_vm2, %v556_v54, %v558_v56 }
 0x179   : > { %v552_v58 = vpop.permute.xlu0 %551  ;;  %793 = vmatpush1.msra.mxu1 %v581_v57 }
 0x17a   : > { %794 = vmatprep.subr.mxu1 %v562_v46  ;;  %v973_v46 = vstv %s972_s10 }
 0x17b   : > { %795 = vmatpush1.msra.mxu1 %v580_v59  ;;  %v554_v60 = vpop.permute.xlu1 %553  ;;  %v974_v50 = vadd.s32 %v973_v46, %v970_v41  ;;  %v975_v51 = vadd.s32 %v973_v46, %v971_v45 }
 0x17c   : > { %796 = vmatprep.subr.mxu1 %v558_v56  ;;  %v578_v63 = vsel %vm575_vm2, %v552_v58, %v554_v60 }
 0x17d   : > { %v548_v62 = vpop.permute.xlu0 %547  ;;  %797 = vmatpush1.msra.mxu1 %v579_v61  ;;  %vm976_vm4 = vcmp.ge.s32.totalorder %v974_v50, 0  ;;  %vm978_vm5 = vcmp.lt.s32.totalorder %v974_v50, 256  ;;  %vm977_vm6 = vcmp.ge.s32.totalorder %v975_v51, 0  ;;  %vm979_vm7 = vcmp.lt.s32.totalorder %v975_v51, 256 }
 0x17e   : > { %798 = vmatprep.subr.mxu1 %v554_v60  ;;  %vm2201_vm8 = vmand %vm976_vm4, %vm978_vm5 }
 0x17f   : > { %799 = vmatpush1.msra.mxu1 %v578_v63  ;;  %v550_v1 = vpop.permute.xlu1 %549  ;;  %vm2207_vm9 = vmand %vm977_vm6, %vm979_vm7 }
 0x180   : > { %v577_v2 = vsel %vm575_vm2, %v548_v62, %v550_v1  ;;  %800 = vmatprep.subr.mxu1 %v550_v1  ;;  %v1105_v62 = vld [vmem:[%s2594_s4 + $0x18] sm:$0xff] }
 0x181   : > { %801 = vmatpush1.msra.mxu1 %v577_v2  ;;  %v544_v4 = vpop.permute.xlu0 %543 }
 0x183   : > { %v546_v5 = vpop.permute.xlu1 %545 }
 0x184   : > { %v576_v6 = vsel %vm575_vm2, %v544_v4, %v546_v5  ;;  %802 = vmatprep.subr.mxu1 %v546_v5 }
 0x185   : > { %803 = vmatpush1.msra.mxu1 %v576_v6 }
 0x186   : > { %804 = vmatprep.subr.mxu1 %v2009_v15  ;;  %v624_v15 = vld [vmem:[%s2592_s2 + $0x48] sm:$0xff] }
 0x187   : > { %805 = vmatpush1.msra.mxu1 %v2005_v12  ;;  %v621_v12 = vld [vmem:[%s2592_s2 + $0x30] sm:$0xff] }
 0x188   : > { %806 = vmatprep.subr.mxu1 %v2001_v7  ;;  %v619_v7 = vld [vmem:[%s2592_s2 + $0x20] sm:$0xff] }
 0x189   : > { %807 = vmatpush1.msra.mxu1 %v1998_v3  ;;  %v618_v3 = vld [vmem:[%s2592_s2 + $0x18] sm:$0xff] }
 0x18a   : > { %1642 = vmatmul.mubr.msk.f32.vlgmr.msra.gmra.mxu1 %vm727_vm3, %v615_v8  ;;  %v1106_v8 = vld [vmem:[%s2594_s4 + $0x20] sm:$0xff] }
 0x18b   : > { %846 = vmatprep.mubr.f32.mxu1 %v1794_v0 }
 0x18e   : > { %1643 = vmatmul.mubr.msk.f32.gmra.mxu1 %vm727_vm3, %v616_v9  ;;  %v2169_v26 = vpop.permute.xlu0 %664 }
 0x18f   : > { %852 = vmatprep.mubr.f32.mxu1 %v1794_v0 }
 0x190   : > { %v2167_v24 = vpop.permute.xlu1 %704 }
 0x192   : > { %1644 = vmatmul.mubr.msk.f32.gmra.mxu1 %vm727_vm3, %v617_v10  ;;  %v2171_v31 = vpop.permute.xlu0 %699 }
 0x193   : > { %858 = vmatprep.mubr.f32.mxu1 %v1794_v0 }
 0x194   : > { %v660_v29 = vpop.permute.xlu1 %659 }
 0x196   : > { %1645 = vmatmul.mubr.msk.f32.gmra.mxu1 %vm727_vm3, %v618_v3  ;;  %v695_v37 = vpop.permute.xlu0 %694 }
 0x197   : > { %864 = vmatprep.mubr.f32.mxu1 %v1794_v0 }
 0x198   : > { %v655_v34 = vpop.permute.xlu1 %654 }
 0x19a   : > { %1646 = vmatmul.mubr.msk.f32.gmra.mxu1 %vm727_vm3, %v619_v7  ;;  %v690_v43 = vpop.permute.xlu0 %689 }
 0x19b   : > { %870 = vmatprep.mubr.f32.mxu1 %v1794_v0 }
 0x19c   : > { %v650_v40 = vpop.permute.xlu1 %649 }
 0x19e   : > { %1647 = vmatmul.mubr.msk.f32.gmra.mxu1 %vm727_vm3, %v620_v11  ;;  %v2195_v52 = vpop.permute.xlu0 %724 }
 0x19f   : > { %876 = vmatprep.mubr.f32.mxu1 %v1794_v0 }
 0x1a0   : > { %v2191_v48 = vpop.permute.xlu1 %684 }
 0x1a2   : > { %1648 = vmatmul.mubr.msk.f32.gmra.mxu1 %vm727_vm3, %v621_v12  ;;  %v2205_v63 = vpop.permute.xlu0 %719 }
 0x1a3   : > { %882 = vmatprep.mubr.f32.mxu1 %v1794_v0 }
 0x1a4   : > { %v2199_v56 = vpop.permute.xlu1 %679 }
 0x1a6   : > { %1649 = vmatmul.mubr.msk.f32.gmra.mxu1 %vm727_vm3, %v622_v13 }
 0x1a7   : > { %888 = vmatprep.mubr.f32.mxu1 %v1794_v0 }
 0x1a8   : > { %v675_v3 = vpop.permute.xlu1 %674 }
 0x1aa   : > { %1650 = vmatmul.mubr.msk.f32.gmra.mxu1 %vm727_vm3, %v623_v14 }
 0x1ab   : > { %894 = vmatprep.mubr.f32.mxu1 %v1794_v0 }
 0x1ae   : > { %1651 = vmatmul.mubr.msk.f32.gmra.mxu1 %vm727_vm3, %v624_v15 }
 0x1af   : > { %900 = vmatprep.mubr.f32.mxu1 %v1794_v0 }
 0x1b2   : > { %1652 = vmatmul.mubr.msk.f32.gmra.mxu1 %vm727_vm3, %v625_v16 }
 0x1b3   : > { %906 = vmatprep.mubr.f32.mxu1 %v1794_v0 }
 0x1b6   : > { %1653 = vmatmul.mubr.msk.f32.gmra.mxu1 %vm727_vm3, %v626_v17 }
 0x1b7   : > { %912 = vmatprep.mubr.f32.mxu1 %v1794_v0 }
 0x1ba   : > { %1654 = vmatmul.mubr.msk.f32.gmra.mxu1 %vm727_vm3, %v627_v18 }
 0x1bb   : > { %918 = vmatprep.mubr.f32.mxu1 %v1794_v0 }
 0x1be   : > { %1655 = vmatmul.mubr.msk.f32.gmra.mxu1 %vm727_vm3, %v628_v19 }
 0x1bf   : > { %924 = vmatprep.mubr.f32.mxu1 %v1794_v0 }
 0x1c2   : > { %1656 = vmatmul.mubr.msk.f32.gmra.mxu1 %vm727_vm3, %v629_v20 }
 0x1c3   : > { %930 = vmatprep.mubr.f32.mxu1 %v1794_v0 }
 0x1c6   : > { %1657 = vmatmul.mubr.msk.f32.gmra.mxu1 %vm727_vm3, %v630_v21  ;;  %v715_v21 = vpop.permute.xlu0 %714 }
 0x24a   : > { %v842_v22 = vpop.f32.mrf.mxu1 }
 0x24b   : > { %v843_v55 = vadd.f32 %v842_v22, %v650_v40 }
 0x24c   : > { %v844_v23 = vpop.f32.mrf.mxu1 }
 0x24d   : > { %v845_v59 = vadd.f32 %v844_v23, %v650_v40 }
 0x24e   : > { %v848_v25 = vpop.f32.mrf.mxu1 }
 0x24f   : > { %v849_v2 = vadd.f32 %v848_v25, %v655_v34 }
 0x250   : > { %v850_v27 = vpop.f32.mrf.mxu1 }
 0x251   : > { %v851_v9 = vadd.f32 %v850_v27, %v655_v34 }
 0x252   : > { %v854_v28 = vpop.f32.mrf.mxu1 }
 0x253   : > { %v855_v14 = vadd.f32 %v854_v28, %v660_v29 }
 0x254   : > { %v856_v30 = vpop.f32.mrf.mxu1 }
 0x255   : > { %v857_v20 = vadd.f32 %v856_v30, %v660_v29  ;;  %v670_v29 = vpop.permute.xlu1 %669 }
 0x256   : > { %v2173_v32 = vpop.f32.mrf.mxu1 }
 0x257   : > { %v861_v34 = vadd.f32 %v2173_v32, %v2169_v26 }
 0x258   : > { %v2175_v33 = vpop.f32.mrf.mxu1 }
 0x25a   : > { %v2177_v35 = vpop.f32.mrf.mxu1 }
 0x25b   : > { %v867_v51 = vadd.f32 %v2177_v35, %v670_v29 }
 0x25c   : > { %v2179_v38 = vpop.f32.mrf.mxu1 }
 0x25e   : > { %v2181_v39 = vpop.f32.mrf.mxu1 }
 0x260   : > { %v2183_v42 = vpop.f32.mrf.mxu1 }
 0x262   : > { %v2187_v44 = vpop.f32.mrf.mxu1 }
 0x264   : > { %v2189_v47 = vpop.f32.mrf.mxu1 }
 0x266   : > { %v2193_v49 = vpop.f32.mrf.mxu1 }
 0x268   : > { %v2197_v53 = vpop.f32.mrf.mxu1 }
 0x26a   : > { %v890_v54 = vpop.f32.mrf.mxu1 }
 0x26b   : > { %v891_v57 = vadd.f32 %v890_v54, %v690_v43  ;;  %v710_v54 = vpop.permute.xlu0 %709 }
 0x26c   : > { %v892_v58 = vpop.f32.mrf.mxu1 }
 0x26d   : > { %v937_v60 = vmax.f32 %v843_v55, %v891_v57  ;;  %v893_v61 = vadd.f32 %v892_v58, %v690_v43 }
 0x26e   : > { %v896_v1 = vpop.f32.mrf.mxu1 }
 0x26f   : > { %v953_v4 = vmax.f32 %v937_v60, 0.0  ;;  %v938_v5 = vmax.f32 %v845_v59, %v893_v61  ;;  %v897_v6 = vadd.f32 %v896_v1, %v695_v37  ;;  %v869_v59 = vadd.f32 %v2179_v38, %v670_v29 }
 0x270   : > { %v898_v10 = vpop.f32.mrf.mxu1 }
 0x271   : > { %v954_v7 = vmax.f32 %v938_v5, 0.0  ;;  %v939_v11 = vmax.f32 %v849_v2, %v897_v6  ;;  %v899_v12 = vadd.f32 %v898_v10, %v695_v37  ;;  %v2213_v13 = vsel %vm2201_vm8, %v953_v4, 0.0 }
 0x272   : > { %v902_v15 = vpop.f32.mrf.mxu1  ;;  %1074 = vrot.lane.b32.xlu1 %v2213_v13, %s1795_s18  ;;  %v873_v2 = vadd.f32 %v2181_v39, %v675_v3  ;;  %v875_v10 = vadd.f32 %v2183_v42, %v675_v3 }
 0x273   : > { %v955_v16 = vmax.f32 %v939_v11, 0.0  ;;  %v940_v17 = vmax.f32 %v851_v9, %v899_v12  ;;  %v903_v18 = vadd.f32 %v902_v15, %v2171_v31  ;;  %v2220_v19 = vsel %vm2207_vm9, %v954_v7, 0.0 }
 0x274   : > { %v904_v22 = vpop.f32.mrf.mxu1  ;;  %1076 = vrot.lane.b32.xlu0 %v2220_v19, %s1795_s18  ;;  %v879_v15 = vadd.f32 %v2187_v44, %v2199_v56 }
 0x275   : > { %v956_v23 = vmax.f32 %v940_v17, 0.0  ;;  %v941_v25 = vmax.f32 %v855_v14, %v903_v18  ;;  %v905_v27 = vadd.f32 %v904_v22, %v2171_v31  ;;  %v2227_v28 = vsel %vm2201_vm8, %v955_v16, 0.0 }
 0x276   : > { %v908_v36 = vpop.f32.mrf.mxu1  ;;  %1078 = vrot.lane.b32.xlu1 %v2227_v28, %s1795_s18  ;;  %v863_v31 = vadd.f32 %v2175_v33, %v2169_v26 }
 0x277   : > { %v957_v30 = vmax.f32 %v941_v25, 0.0  ;;  %v942_v37 = vmax.f32 %v857_v20, %v905_v27  ;;  %v909_v40 = vadd.f32 %v908_v36, %v2167_v24  ;;  %v2236_v41 = vsel %vm2207_vm9, %v956_v23, 0.0 }
 0x278   : > { %v910_v43 = vpop.f32.mrf.mxu1  ;;  %1080 = vrot.lane.b32.xlu0 %v2236_v41, %s1795_s18  ;;  %v881_v20 = vadd.f32 %v2189_v47, %v2199_v56  ;;  %v885_v27 = vadd.f32 %v2193_v49, %v2191_v48 }
 0x279   : > { %v958_v32 = vmax.f32 %v942_v37, 0.0  ;;  %v943_v45 = vmax.f32 %v861_v34, %v909_v40  ;;  %v911_v46 = vadd.f32 %v910_v43, %v2167_v24  ;;  %v2245_v50 = vsel %vm2201_vm8, %v957_v30, 0.0 }
 0x27a   : > { %v914_v55 = vpop.f32.mrf.mxu1  ;;  %1082 = vrot.lane.b32.xlu1 %v2245_v50, %s1795_s18 }
 0x27b   : > { %v959_v26 = vmax.f32 %v943_v45, 0.0  ;;  %v944_v33 = vmax.f32 %v863_v31, %v911_v46  ;;  %v915_v57 = vadd.f32 %v914_v55, %v710_v54  ;;  %v991_v58 = vsel %vm2207_vm9, %v958_v32, 0.0  ;;  %v1118_v46 = vld [vmem:[%s2595_s5] sm:$0xff] }
 0x27c   : > { %v916_v24 = vpop.f32.mrf.mxu1  ;;  %1084 = vrot.lane.b32.xlu0 %v991_v58, %s1795_s18  ;;  %v1126_v55 = vld [vmem:[%s2595_s5 + $0x40] sm:$0xff] }
 0x27d   : > { %v960_v60 = vmax.f32 %v944_v33, 0.0  ;;  %v945_v61 = vmax.f32 %v867_v51, %v915_v57  ;;  %v917_v1 = vadd.f32 %v916_v24, %v710_v54  ;;  %v992_v35 = vsel %vm2201_vm8, %v959_v26, 0.0  ;;  %v1124_v51 = vld [vmem:[%s2595_s5 + $0x30] sm:$0xff]  ;;  %v1125_v54 = vld [vmem:[%s2595_s5 + $0x38] sm:$0xff]  ;;  %v1127_v26 = vld [vmem:[%s2595_s5 + $0x48] sm:$0xff] }
 0x27e   : > { %v920_v4 = vpop.f32.mrf.mxu1  ;;  %1086 = vrot.lane.b32.xlu1 %v992_v35, %s1795_s18  ;;  %v1128_v33 = vld [vmem:[%s2595_s5 + $0x50] sm:$0xff]  ;;  %v1129_v57 = vld [vmem:[%s2595_s5 + $0x58] sm:$0xff] }
 0x27f   : > { %v2258_v5 = vmax.f32 %v945_v61, 0.0  ;;  %v946_v6 = vmax.f32 %v869_v59, %v917_v1  ;;  %v921_v9 = vadd.f32 %v920_v4, %v715_v21  ;;  %v993_v38 = vsel %vm2207_vm9, %v960_v60, 0.0  ;;  %v1131_v59 = vld [vmem:[%s2595_s5 + $0x68] sm:$0xff]  ;;  %v1132_v24 = vld [vmem:[%s2595_s5 + $0x70] sm:$0xff]  ;;  %v1133_v60 = vld [vmem:[%s2595_s5 + $0x78] sm:$0xff] }
 0x280   : > { %v922_v7 = vpop.f32.mrf.mxu1  ;;  %1088 = vrot.lane.b32.xlu0 %v993_v38, %s1795_s18 }
 0x281   : > { %v2264_v11 = vmax.f32 %v946_v6, 0.0  ;;  %v947_v12 = vmax.f32 %v873_v2, %v921_v9  ;;  %v923_v14 = vadd.f32 %v922_v7, %v715_v21  ;;  %v994_v39 = vsel %vm2201_vm8, %v2258_v5, 0.0 }
 0x282   : > { %v926_v16 = vpop.f32.mrf.mxu1  ;;  %1034 = vrot.lane.b32.xlu1 %v994_v39, %s1796_s19 }
 0x283   : > { %v2272_v17 = vmax.f32 %v947_v12, 0.0  ;;  %v948_v42 = vmax.f32 %v875_v10, %v923_v14  ;;  %v927_v3 = vadd.f32 %v926_v16, %v2205_v63  ;;  %v995_v18 = vsel %vm2207_vm9, %v2264_v11, 0.0 }
 0x284   : > { %v928_v21 = vpop.f32.mrf.mxu1  ;;  %1036 = vrot.lane.b32.xlu0 %v995_v18, %s1796_s19 }
 0x285   : > { %v2281_v22 = vmax.f32 %v948_v42, 0.0  ;;  %v949_v44 = vmax.f32 %v879_v15, %v927_v3  ;;  %v929_v23 = vadd.f32 %v928_v21, %v2205_v63  ;;  %v996_v25 = vsel %vm2201_vm8, %v2272_v17, 0.0 }
 0x286   : > { %v932_v34 = vpop.f32.mrf.mxu1  ;;  %1038 = vrot.lane.b32.xlu1 %v996_v25, %s1796_s19  ;;  %v887_v63 = vadd.f32 %v2197_v53, %v2191_v48 }
 0x287   : > { %v2290_v36 = vmax.f32 %v949_v44, 0.0  ;;  %v950_v47 = vmax.f32 %v881_v20, %v929_v23  ;;  %v933_v56 = vadd.f32 %v932_v34, %v2195_v52  ;;  %v997_v29 = vsel %vm2207_vm9, %v2281_v22, 0.0 }
 0x288   : > { %v934_v30 = vpop.f32.mrf.mxu1  ;;  %1040 = vrot.lane.b32.xlu0 %v997_v29, %s1796_s19 }
 0x289   : > { %v2299_v37 = vmax.f32 %v950_v47, 0.0  ;;  %v951_v49 = vmax.f32 %v885_v27, %v933_v56  ;;  %v935_v40 = vadd.f32 %v934_v30, %v2195_v52  ;;  %v998_v31 = vsel %vm2201_vm8, %v2290_v36, 0.0 }
 0x28a   : > { %1042 = vrot.lane.b32.xlu1 %v998_v31, %s1796_s19 }
 0x28b   : > { %v2306_v43 = vmax.f32 %v951_v49, 0.0  ;;  %v952_v32 = vmax.f32 %v887_v63, %v935_v40  ;;  %v999_v48 = vsel %vm2207_vm9, %v2299_v37, 0.0 }
 0x28c   : > { %1044 = vrot.lane.b32.xlu0 %v999_v48, %s1796_s19 }
 0x28d   : > { %v2312_v53 = vmax.f32 %v952_v32, 0.0  ;;  %v1000_v52 = vsel %vm2201_vm8, %v2306_v43, 0.0 }
 0x28e   : > { %1046 = vrot.lane.b32.xlu1 %v1000_v52, %s1796_s19 }
 0x28f   : > { %v1001_v45 = vsel %vm2207_vm9, %v2312_v53, 0.0 }
 0x290   : > { %1048 = vrot.lane.b32.xlu0 %v1001_v45, %s1796_s19  ;;  %v1112_v45 = vld [vmem:[%s2594_s4 + $0x50] sm:$0xff] }
 0x292   : > { %1030 = vrot.lane.b32.xlu1 %v992_v35, %s1796_s19 }
 0x294   : > { %1032 = vrot.lane.b32.xlu0 %v993_v38, %s1796_s19 }
 0x296   : > { %1026 = vrot.lane.b32.xlu1 %v2245_v50, %s1796_s19  ;;  %v1119_v50 = vld [vmem:[%s2595_s5 + $0x8] sm:$0xff] }
 0x298   : > { %1028 = vrot.lane.b32.xlu0 %v991_v58, %s1796_s19  ;;  %v1130_v58 = vld [vmem:[%s2595_s5 + $0x60] sm:$0xff] }
 0x29a   : > { %1022 = vrot.lane.b32.xlu1 %v2227_v28, %s1796_s19  ;;  %v1120_v28 = vld [vmem:[%s2595_s5 + $0x10] sm:$0xff] }
 0x29c   : > { %1024 = vrot.lane.b32.xlu0 %v2236_v41, %s1796_s19  ;;  %v1122_v41 = vld [vmem:[%s2595_s5 + $0x20] sm:$0xff] }
 0x29e   : > { %1018 = vrot.lane.b32.xlu1 %v2213_v13, %s1796_s19  ;;  %v1121_v13 = vld [vmem:[%s2595_s5 + $0x18] sm:$0xff] }
 0x2a0   : > { %1020 = vrot.lane.b32.xlu0 %v2220_v19, %s1796_s19  ;;  %v1123_v19 = vld [vmem:[%s2595_s5 + $0x28] sm:$0xff] }
 0x2a2   : > { %1136 = vperm.xlu1 %1737, %v1118_v46   ;;  %v1113_v46 = vld [vmem:[%s2594_s4 + $0x58] sm:$0xff] }
 0x2a4   : > { %1141 = vperm.xlu0 %1736, %v1119_v50   ;;  %v1114_v50 = vld [vmem:[%s2594_s4 + $0x60] sm:$0xff] }
 0x2a6   : > { %1146 = vperm.xlu1 %1737, %v1120_v28   ;;  %v1115_v28 = vld [vmem:[%s2594_s4 + $0x68] sm:$0xff] }
 0x2a8   : > { %1151 = vperm.xlu0 %1736, %v1121_v13   ;;  %v1116_v13 = vld [vmem:[%s2594_s4 + $0x70] sm:$0xff] }
 0x2aa   : > { %1156 = vperm.xlu1 %1737, %v1122_v41   ;;  %v1117_v41 = vld [vmem:[%s2594_s4 + $0x78] sm:$0xff] }
 0x2ac   : > { %1161 = vperm.xlu0 %1736, %v1123_v19  }
 0x2ae   : > { %1166 = vperm.xlu1 %1737, %v1124_v51  }
 0x2b0   : > { %1171 = vperm.xlu0 %1736, %v1125_v54  }
 0x2b2   : > { %1176 = vperm.xlu1 %1737, %v1126_v55  }
 0x2b4   : > { %1181 = vperm.xlu0 %1736, %v1127_v26  }
 0x2b6   : > { %1186 = vperm.xlu1 %1737, %v1128_v33  }
 0x2b8   : > { %1191 = vperm.xlu0 %1736, %v1129_v57  }
 0x2ba   : > { %1196 = vperm.xlu1 %1737, %v1130_v58  }
 0x2bc   : > { %1201 = vperm.xlu0 %1736, %v1131_v59  }
 0x2be   : > { %1206 = vperm.xlu1 %1737, %v1132_v24  }
 0x2c0   : > { %1211 = vperm.xlu0 %1736, %v1133_v60  }
 0x2e4   : > { %v1075_v61 = vpop.permute.xlu1 %1074 }
 0x2e6   : > { %v1077_v1 = vpop.permute.xlu0 %1076 }
 0x2e7   : > { %v1090_v16 = vsel %vm608_vm1, %v1075_v61, %v1077_v1 }
 0x2e8   : > { %v1079_v35 = vpop.permute.xlu1 %1078 }
 0x2ea   : > { %v1081_v2 = vpop.permute.xlu0 %1080 }
 0x2eb   : > { %v1091_v39 = vsel %vm608_vm1, %v1079_v35, %v1081_v2 }
 0x2ec   : > { %v1083_v4 = vpop.permute.xlu1 %1082 }
 0x2ee   : > { %v1085_v6 = vpop.permute.xlu0 %1084 }
 0x2ef   : > { %v1092_v12 = vsel %vm608_vm1, %v1083_v4, %v1085_v6 }
 0x2f0   : > { %v1087_v9 = vpop.permute.xlu1 %1086 }
 0x2f2   : > { %v1089_v38 = vpop.permute.xlu0 %1088 }
 0x2f3   : > { %v1093_v10 = vsel %vm608_vm1, %v1087_v9, %v1089_v38  ;;  %1214 = vmatprep.subr.mxu0 %v1089_v38 }
 0x2f4   : > { %1215 = vmatpush1.msra.mxu0 %v1093_v10  ;;  %v1035_v7 = vpop.permute.xlu1 %1034 }
 0x2f5   : > { %1216 = vmatprep.subr.mxu0 %v1085_v6 }
 0x2f6   : > { %v1037_v14 = vpop.permute.xlu0 %1036  ;;  %1217 = vmatpush1.msra.mxu0 %v1092_v12 }
 0x2f7   : > { %1218 = vmatprep.subr.mxu0 %v1081_v2  ;;  %v1054_v56 = vsel %vm575_vm2, %v1035_v7, %v1037_v14 }
 0x2f8   : > { %1219 = vmatpush1.msra.mxu0 %v1091_v39  ;;  %v1039_v15 = vpop.permute.xlu1 %1038 }
 0x2f9   : > { %1220 = vmatprep.subr.mxu0 %v1077_v1 }
 0x2fa   : > { %v1041_v42 = vpop.permute.xlu0 %1040  ;;  %1221 = vmatpush1.msra.mxu0 %v1090_v16 }
 0x2fb   : > { %v1055_v34 = vsel %vm575_vm2, %v1039_v15, %v1041_v42 }
 0x2fc   : > { %v1043_v3 = vpop.permute.xlu1 %1042 }
 0x2fe   : > { %v1045_v18 = vpop.permute.xlu0 %1044 }
 0x2ff   : > { %v1056_v25 = vsel %vm575_vm2, %v1043_v3, %v1045_v18 }
 0x300   : > { %v1047_v20 = vpop.permute.xlu1 %1046 }
 0x302   : > { %v1049_v21 = vpop.permute.xlu0 %1048 }
 0x303   : > { %v1057_v44 = vsel %vm575_vm2, %v1047_v20, %v1049_v21  ;;  %1222 = vmatprep.subr.mxu0 %v1049_v21 }
 0x304   : > { %1223 = vmatpush1.msra.mxu0 %v1057_v44  ;;  %v1031_v23 = vpop.permute.xlu1 %1030 }
 0x305   : > { %1224 = vmatprep.subr.mxu0 %v1045_v18 }
 0x306   : > { %v1033_v27 = vpop.permute.xlu0 %1032  ;;  %1225 = vmatpush1.msra.mxu0 %v1056_v25 }
 0x307   : > { %1226 = vmatprep.subr.mxu0 %v1041_v42  ;;  %v1053_v63 = vsel %vm575_vm2, %v1031_v23, %v1033_v27 }
 0x308   : > { %1227 = vmatpush1.msra.mxu0 %v1055_v34  ;;  %v1027_v47 = vpop.permute.xlu1 %1026 }
 0x309   : > { %1228 = vmatprep.subr.mxu0 %v1037_v14 }
 0x30a   : > { %v1029_v29 = vpop.permute.xlu0 %1028  ;;  %1229 = vmatpush1.msra.mxu0 %v1054_v56 }
 0x30b   : > { %1230 = vmatprep.subr.mxu0 %v1033_v27  ;;  %v1052_v49 = vsel %vm575_vm2, %v1027_v47, %v1029_v29 }
 0x30c   : > { %1231 = vmatpush1.msra.mxu0 %v1053_v63  ;;  %v1023_v30 = vpop.permute.xlu1 %1022 }
 0x30d   : > { %1232 = vmatprep.subr.mxu0 %v1029_v29 }
 0x30e   : > { %v1025_v40 = vpop.permute.xlu0 %1024  ;;  %1233 = vmatpush1.msra.mxu0 %v1052_v49 }
 0x30f   : > { %v1051_v31 = vsel %vm575_vm2, %v1023_v30, %v1025_v40  ;;  %1234 = vmatprep.subr.mxu0 %v1025_v40 }
 0x310   : > { %1235 = vmatpush1.msra.mxu0 %v1051_v31  ;;  %v1019_v32 = vpop.permute.xlu1 %1018 }
 0x312   : > { %v1021_v48 = vpop.permute.xlu0 %1020 }
 0x313   : > { %v1050_v52 = vsel %vm575_vm2, %v1019_v32, %v1021_v48  ;;  %1236 = vmatprep.subr.mxu0 %v1021_v48 }
 0x314   : > { %1237 = vmatpush1.msra.mxu0 %v1050_v52 }
 0x315   : > { %1658 = vmatprep.subr.msk.mxu0 %vm2207_vm9, %v2312_v53  ;;  %v1111_v53 = vld [vmem:[%s2594_s4 + $0x48] sm:$0xff] }
 0x316   : > { %1659 = vmatpush1.msk.msra.mxu0 %vm2201_vm8, %v2306_v43  ;;  %v1102_v43 = vld [vmem:[%s2594_s4] sm:$0xff] }
 0x317   : > { %1660 = vmatprep.subr.msk.mxu0 %vm2207_vm9, %v2299_v37  ;;  %v1110_v37 = vld [vmem:[%s2594_s4 + $0x40] sm:$0xff] }
 0x318   : > { %1661 = vmatpush1.msk.msra.mxu0 %vm2201_vm8, %v2290_v36  ;;  %v1109_v36 = vld [vmem:[%s2594_s4 + $0x38] sm:$0xff] }
 0x319   : > { %1662 = vmatprep.subr.msk.mxu0 %vm2207_vm9, %v2281_v22  ;;  %v1103_v22 = vld [vmem:[%s2594_s4 + $0x8] sm:$0xff] }
 0x31a   : > { %1663 = vmatpush1.msk.msra.mxu0 %vm2201_vm8, %v2272_v17  ;;  %v1104_v17 = vld [vmem:[%s2594_s4 + $0x10] sm:$0xff] }
 0x31b   : > { %1664 = vmatprep.subr.msk.mxu0 %vm2207_vm9, %v2264_v11  ;;  %v1108_v11 = vld [vmem:[%s2594_s4 + $0x30] sm:$0xff] }
 0x31c   : > { %1665 = vmatpush1.msk.msra.mxu0 %vm2201_vm8, %v2258_v5  ;;  %v1107_v5 = vld [vmem:[%s2594_s4 + $0x28] sm:$0xff] }
 0x31d   : > { %1279 = vmatmul.mubr.f32.vlgmr.msra.gmra.mxu0 %v1102_v43  ;;  %v1137_v26 = vpop.permute.xlu1 %1136 }
 0x31e   : > { %1284 = vmatprep.mubr.f32.mxu0 %v1794_v0 }
 0x31f   : > { %v1142_v58 = vpop.permute.xlu0 %1141 }
 0x321   : > { %1285 = vmatmul.mubr.f32.gmra.mxu0 %v1103_v22  ;;  %v1147_v24 = vpop.permute.xlu1 %1146 }
 0x322   : > { %1290 = vmatprep.mubr.f32.mxu0 %v1794_v0 }
 0x323   : > { %v1152_v1 = vpop.permute.xlu0 %1151 }
 0x325   : > { %1291 = vmatmul.mubr.f32.gmra.mxu0 %v1104_v17 }
 0x326   : > { %1296 = vmatprep.mubr.f32.mxu0 %v1794_v0 }
 0x327   : > { %v2490_v6 = vpop.permute.xlu0 %1161 }
 0x329   : > { %1297 = vmatmul.mubr.f32.gmra.mxu0 %v1105_v62 }
 0x32a   : > { %1302 = vmatprep.mubr.f32.mxu0 %v1794_v0 }
 0x32b   : > { %v2500_v12 = vpop.permute.xlu0 %1171 }
 0x32d   : > { %1303 = vmatmul.mubr.f32.gmra.mxu0 %v1106_v8 }
 0x32e   : > { %1308 = vmatprep.mubr.f32.mxu0 %v1794_v0 }
 0x32f   : > { %v1182_v44 = vpop.permute.xlu0 %1181 }
 0x331   : > { %1309 = vmatmul.mubr.f32.gmra.mxu0 %v1107_v5 }
 0x332   : > { %1314 = vmatprep.mubr.f32.mxu0 %v1794_v0 }
 0x335   : > { %1315 = vmatmul.mubr.f32.gmra.mxu0 %v1108_v11  ;;  %v1192_v11 = vpop.permute.xlu0 %1191 }
 0x336   : > { %1320 = vmatprep.mubr.f32.mxu0 %v1794_v0 }
 0x339   : > { %1321 = vmatmul.mubr.f32.gmra.mxu0 %v1109_v36 }
 0x33a   : > { %1326 = vmatprep.mubr.f32.mxu0 %v1794_v0 }
 0x33d   : > { %1327 = vmatmul.mubr.f32.gmra.mxu0 %v1110_v37 }
 0x33e   : > { %1332 = vmatprep.mubr.f32.mxu0 %v1794_v0 }
 0x341   : > { %1333 = vmatmul.mubr.f32.gmra.mxu0 %v1111_v53 }
 0x342   : > { %1338 = vmatprep.mubr.f32.mxu0 %v1794_v0 }
 0x345   : > { %1339 = vmatmul.mubr.f32.gmra.mxu0 %v1112_v45 }
 0x346   : > { %1344 = vmatprep.mubr.f32.mxu0 %v1794_v0 }
 0x349   : > { %1345 = vmatmul.mubr.f32.gmra.mxu0 %v1113_v46 }
 0x34a   : > { %1350 = vmatprep.mubr.f32.mxu0 %v1794_v0 }
 0x34d   : > { %1351 = vmatmul.mubr.f32.gmra.mxu0 %v1114_v50 }
 0x34e   : > { %1356 = vmatprep.mubr.f32.mxu0 %v1794_v0 }
 0x351   : > { %1357 = vmatmul.mubr.f32.gmra.mxu0 %v1115_v28 }
 0x352   : > { %1362 = vmatprep.mubr.f32.mxu0 %v1794_v0 }
 0x355   : > { %1363 = vmatmul.mubr.f32.gmra.mxu0 %v1116_v13 }
 0x356   : > { %1368 = vmatprep.mubr.f32.mxu0 %v1794_v0  ;;  %v2484_v0 = vpop.permute.xlu1 %1156 }
 0x359   : > { %1369 = vmatmul.mubr.f32.gmra.mxu0 %v1117_v41 }
 0x35a   : > { %v2494_v38 = vpop.permute.xlu1 %1166 }
 0x35e   : > { %v1177_v39 = vpop.permute.xlu1 %1176 }
 0x362   : > { %v1187_v40 = vpop.permute.xlu1 %1186 }
 0x3dd   : > { %v1280_v19 = vpop.f32.mrf.mxu0 }
 0x3de   : > { %v1281_v16 = vadd.f32 %v1280_v19, %v1137_v26 }
 0x3df   : > { %v1282_v51 = vpop.f32.mrf.mxu0 }
 0x3e0   : > { %v1283_v18 = vadd.f32 %v1282_v51, %v1137_v26  ;;  %v1197_v51 = vpop.permute.xlu1 %1196 }
 0x3e1   : > { %v1286_v54 = vpop.f32.mrf.mxu0 }
 0x3e2   : > { %v1287_v25 = vadd.f32 %v1286_v54, %v1142_v58 }
 0x3e3   : > { %v1288_v55 = vpop.f32.mrf.mxu0 }
 0x3e4   : > { %v1289_v29 = vadd.f32 %v1288_v55, %v1142_v58 }
 0x3e5   : > { %v1292_v33 = vpop.f32.mrf.mxu0 }
 0x3e6   : > { %v1293_v32 = vadd.f32 %v1292_v33, %v1147_v24 }
 0x3e7   : > { %v1294_v57 = vpop.f32.mrf.mxu0 }
 0x3e8   : > { %v1295_v17 = vadd.f32 %v1294_v57, %v1147_v24 }
 0x3e9   : > { %v1298_v59 = vpop.f32.mrf.mxu0 }
 0x3ea   : > { %v1299_v37 = vadd.f32 %v1298_v59, %v1152_v1 }
 0x3eb   : > { %v1300_v60 = vpop.f32.mrf.mxu0 }
 0x3ec   : > { %v1301_v28 = vadd.f32 %v1300_v60, %v1152_v1 }
 0x3ed   : > { %v1304_v61 = vpop.f32.mrf.mxu0 }
 0x3ee   : > { %v1305_v55 = vadd.f32 %v1304_v61, %v2484_v0 }
 0x3ef   : > { %v2482_v35 = vpop.f32.mrf.mxu0 }
 0x3f0   : > { %v1307_v59 = vadd.f32 %v2482_v35, %v2484_v0 }
 0x3f1   : > { %v2486_v2 = vpop.f32.mrf.mxu0 }
 0x3f3   : > { %v2488_v4 = vpop.f32.mrf.mxu0 }
 0x3f5   : > { %v2492_v9 = vpop.f32.mrf.mxu0 }
 0x3f7   : > { %v2496_v10 = vpop.f32.mrf.mxu0 }
 0x3f9   : > { %v2498_v7 = vpop.f32.mrf.mxu0 }
 0x3fb   : > { %v2502_v14 = vpop.f32.mrf.mxu0 }
 0x3fd   : > { %v1328_v15 = vpop.f32.mrf.mxu0 }
 0x3fe   : > { %v1329_v42 = vadd.f32 %v1328_v15, %v1177_v39 }
 0x3ff   : > { %v1330_v3 = vpop.f32.mrf.mxu0 }
 0x400   : > { %v1375_v20 = vmax.f32 %v1281_v16, %v1329_v42  ;;  %v1331_v21 = vadd.f32 %v1330_v3, %v1177_v39  ;;  %v1202_v39 = vpop.permute.xlu0 %1201  ;;  %v1311_v16 = vadd.f32 %v2486_v2, %v2490_v6 }
 0x401   : > { %v1334_v23 = vpop.f32.mrf.mxu0 }
 0x402   : > { %v1391_v27 = vmax.f32 %v1375_v20, 0.0  ;;  %v1376_v34 = vmax.f32 %v1283_v18, %v1331_v21  ;;  %v1335_v47 = vadd.f32 %v1334_v23, %v1182_v44  ;;  %v1313_v20 = vadd.f32 %v2488_v4, %v2490_v6 }
 0x403   : > { %v1336_v56 = vpop.f32.mrf.mxu0 }
 0x404   : > { %v1392_v63 = vmax.f32 %v1376_v34, 0.0  ;;  %v1377_v30 = vmax.f32 %v1287_v25, %v1335_v47  ;;  %v1337_v49 = vadd.f32 %v1336_v56, %v1182_v44  ;;  %1423 = vrot.lane.b32.xlu1 %v1391_v27, %s1795_s18  ;;  %v1207_v44 = vpop.permute.xlu1 %1206  ;;  %v1317_v25 = vadd.f32 %v2492_v9, %v2494_v38 }
 0x405   : > { %v1340_v31 = vpop.f32.mrf.mxu0  ;;  %v1319_v56 = vadd.f32 %v2496_v10, %v2494_v38  ;;  %v1325_v38 = vadd.f32 %v2502_v14, %v2500_v12 }
 0x406   : > { %v1393_v48 = vmax.f32 %v1377_v30, 0.0  ;;  %v1378_v52 = vmax.f32 %v1289_v29, %v1337_v49  ;;  %v1341_v43 = vadd.f32 %v1340_v31, %v1187_v40  ;;  %1425 = vrot.lane.b32.xlu0 %v1392_v63, %s1795_s18  ;;  %v1212_v63 = vpop.permute.xlu0 %1211  ;;  %v1323_v49 = vadd.f32 %v2498_v7, %v2500_v12 }
 0x407   : > { %v1342_v22 = vpop.f32.mrf.mxu0 }
 0x408   : > { %v1394_v62 = vmax.f32 %v1378_v52, 0.0  ;;  %v1379_v8 = vmax.f32 %v1293_v32, %v1341_v43  ;;  %v1343_v5 = vadd.f32 %v1342_v22, %v1187_v40  ;;  %1427 = vrot.lane.b32.xlu1 %v1393_v48, %s1795_s18 }
 0x409   : > { %v1346_v36 = vpop.f32.mrf.mxu0 }
 0x40a   : > { %v1395_v53 = vmax.f32 %v1379_v8, 0.0  ;;  %v1380_v45 = vmax.f32 %v1295_v17, %v1343_v5  ;;  %v1347_v46 = vadd.f32 %v1346_v36, %v1192_v11  ;;  %1429 = vrot.lane.b32.xlu0 %v1394_v62, %s1795_s18 }
 0x40b   : > { %v1348_v50 = vpop.f32.mrf.mxu0 }
 0x40c   : > { %v1396_v13 = vmax.f32 %v1380_v45, 0.0  ;;  %v1381_v41 = vmax.f32 %v1299_v37, %v1347_v46  ;;  %v1349_v19 = vadd.f32 %v1348_v50, %v1192_v11  ;;  %1431 = vrot.lane.b32.xlu1 %v1395_v53, %s1795_s18 }
 0x40d   : > { %v1352_v54 = vpop.f32.mrf.mxu0 }
 0x40e   : > { %v1397_v26 = vmax.f32 %v1381_v41, 0.0  ;;  %v1382_v33 = vmax.f32 %v1301_v28, %v1349_v19  ;;  %v1353_v57 = vadd.f32 %v1352_v54, %v1197_v51  ;;  %1433 = vrot.lane.b32.xlu0 %v1396_v13, %s1795_s18 }
 0x40f   : > { %v1354_v58 = vpop.f32.mrf.mxu0 }
 0x410   : > { %v1398_v24 = vmax.f32 %v1382_v33, 0.0  ;;  %v1383_v60 = vmax.f32 %v1305_v55, %v1353_v57  ;;  %v1355_v1 = vadd.f32 %v1354_v58, %v1197_v51  ;;  %1435 = vrot.lane.b32.xlu1 %v1397_v26, %s1795_s18 }
 0x411   : > { %v1358_v15 = vpop.f32.mrf.mxu0 }
 0x412   : > { %v1399_v61 = vmax.f32 %v1383_v60, 0.0  ;;  %v1384_v42 = vmax.f32 %v1307_v59, %v1355_v1  ;;  %v1359_v3 = vadd.f32 %v1358_v15, %v1202_v39  ;;  %1437 = vrot.lane.b32.xlu0 %v1398_v24, %s1795_s18 }
 0x413   : > { %v1360_v18 = vpop.f32.mrf.mxu0 }
 0x414   : > { %v1400_v35 = vmax.f32 %v1384_v42, 0.0  ;;  %v1385_v0 = vmax.f32 %v1311_v16, %v1359_v3  ;;  %v1361_v21 = vadd.f32 %v1360_v18, %v1202_v39  ;;  %1439 = vrot.lane.b32.xlu1 %v1399_v61, %s1795_s18 }
 0x415   : > { %v1364_v23 = vpop.f32.mrf.mxu0 }
 0x416   : > { %v1401_v2 = vmax.f32 %v1385_v0, 0.0  ;;  %v1386_v27 = vmax.f32 %v1313_v20, %v1361_v21  ;;  %v1365_v34 = vadd.f32 %v1364_v23, %v1207_v44  ;;  %1441 = vrot.lane.b32.xlu0 %v1400_v35, %s1795_s18 }
 0x417   : > { %v1366_v47 = vpop.f32.mrf.mxu0 }
 0x418   : > { %v1402_v4 = vmax.f32 %v1386_v27, 0.0  ;;  %v1387_v6 = vmax.f32 %v1317_v25, %v1365_v34  ;;  %v1367_v29 = vadd.f32 %v1366_v47, %v1207_v44  ;;  %1443 = vrot.lane.b32.xlu1 %v1401_v2, %s1795_s18 }
 0x419   : > { %v1370_v30 = vpop.f32.mrf.mxu0 }
 0x41a   : > { %v1403_v9 = vmax.f32 %v1387_v6, 0.0  ;;  %v1388_v40 = vmax.f32 %v1319_v56, %v1367_v29  ;;  %v1371_v31 = vadd.f32 %v1370_v30, %v1212_v63  ;;  %1445 = vrot.lane.b32.xlu0 %v1402_v4, %s1795_s18 }
 0x41b   : > { %v1372_v32 = vpop.f32.mrf.mxu0 }
 0x41c   : > { %v1404_v10 = vmax.f32 %v1388_v40, 0.0  ;;  %v1389_v48 = vmax.f32 %v1323_v49, %v1371_v31  ;;  %v1373_v52 = vadd.f32 %v1372_v32, %v1212_v63  ;;  %1447 = vrot.lane.b32.xlu1 %v1403_v9, %s1795_s18 }
 0x41e   : > { %v1405_v43 = vmax.f32 %v1389_v48, 0.0  ;;  %v1390_v22 = vmax.f32 %v1325_v38, %v1373_v52  ;;  %1449 = vrot.lane.b32.xlu0 %v1404_v10, %s1795_s18 }
 0x420   : > { %v1406_v7 = vmax.f32 %v1390_v22, 0.0  ;;  %1451 = vrot.lane.b32.xlu1 %v1405_v43, %s1795_s18 }
 0x422   : > { %1453 = vrot.lane.b32.xlu0 %v1406_v7, %s1795_s18  ;;  %s1487_s18 = sadd.s32 (%p1879_p5), %s1776_s23, %s1667_s21 }
 0x423   : > { %s1668_s8 = sshll.u32 (%p1879_p5), %s1487_s18, 3 }
 0x424   : > { %s1489_s9 = scalar_lea.vmem (%p1879_p5), %s2596_s6, %s1668_s8 }
 0x476   : > { %v1424_v17 = vpop.permute.xlu1 %1423 }
 0x478   : > { %v1426_v62 = vpop.permute.xlu0 %1425 }
 0x479   : > { %v1455_v12 = vsel %vm608_vm1, %v1424_v17, %v1426_v62 }
 0x47a   : > { %1471 = vst [vmem:[%s2537_s20] sm:$0xff] %v1455_v12  ;;  %v1428_v14 = vpop.permute.xlu1 %1427 }
 0x47c   : > { %v1430_v8 = vpop.permute.xlu0 %1429 }
 0x47d   : > { %v1456_v5 = vsel %vm608_vm1, %v1428_v14, %v1430_v8 }
 0x47e   : > { %1472 = vst [vmem:[%s2537_s20 + $0x8] sm:$0xff] %v1456_v5  ;;  %v1432_v11 = vpop.permute.xlu1 %1431 }
 0x480   : > { %v1434_v36 = vpop.permute.xlu0 %1433 }
 0x481   : > { %v1457_v37 = vsel %vm608_vm1, %v1432_v11, %v1434_v36  ;;  %v1532_v59 = vld [vmem:[%s2537_s20] sm:$0xff] (%p1879_p5) }
 0x482   : > { %1473 = vst [vmem:[%s2537_s20 + $0x10] sm:$0xff] %v1457_v37  ;;  %v1436_v53 = vpop.permute.xlu1 %1435  ;;  %1533 = vst [vmem:[%s1489_s9] sm:$0xff] (%p1879_p5), %v1532_v59 }
 0x484   : > { %v1438_v45 = vpop.permute.xlu0 %1437 }
 0x485   : > { %v1458_v46 = vsel %vm608_vm1, %v1436_v53, %v1438_v45  ;;  %v1534_v24 = vld [vmem:[%s2537_s20 + $0x8] sm:$0xff] (%p1879_p5) }
 0x486   : > { %1474 = vst [vmem:[%s2537_s20 + $0x18] sm:$0xff] %v1458_v46  ;;  %v1440_v50 = vpop.permute.xlu1 %1439  ;;  %1535 = vst [vmem:[%s1489_s9 + $0x10] sm:$0xff] (%p1879_p5), %v1534_v24 }
 0x488   : > { %v1442_v28 = vpop.permute.xlu0 %1441 }
 0x489   : > { %v1459_v13 = vsel %vm608_vm1, %v1440_v50, %v1442_v28  ;;  %v1536_v60 = vld [vmem:[%s2537_s20 + $0x10] sm:$0xff] (%p1879_p5) }
 0x48a   : > { %1475 = vst [vmem:[%s2537_s20 + $0x20] sm:$0xff] %v1459_v13  ;;  %v1444_v41 = vpop.permute.xlu1 %1443  ;;  %1537 = vst [vmem:[%s1489_s9 + $0x20] sm:$0xff] (%p1879_p5), %v1536_v60 }
 0x48c   : > { %v1446_v19 = vpop.permute.xlu0 %1445 }
 0x48d   : > { %v1460_v51 = vsel %vm608_vm1, %v1444_v41, %v1446_v19  ;;  %v1538_v1 = vld [vmem:[%s2537_s20 + $0x18] sm:$0xff] (%p1879_p5) }
 0x48e   : > { %1476 = vst [vmem:[%s2537_s20 + $0x28] sm:$0xff] %v1460_v51  ;;  %v1448_v54 = vpop.permute.xlu1 %1447  ;;  %1539 = vst [vmem:[%s1489_s9 + $0x30] sm:$0xff] (%p1879_p5), %v1538_v1 }
 0x490   : > { %v1450_v55 = vpop.permute.xlu0 %1449 }
 0x491   : > { %v1461_v26 = vsel %vm608_vm1, %v1448_v54, %v1450_v55  ;;  %v1540_v39 = vld [vmem:[%s2537_s20 + $0x20] sm:$0xff] (%p1879_p5) }
 0x492   : > { %1477 = vst [vmem:[%s2537_s20 + $0x30] sm:$0xff] %v1461_v26  ;;  %v1452_v33 = vpop.permute.xlu1 %1451  ;;  %1485 = sbr.rel (!%p1879_p5) target bundleno = 1183 (0x49f), region = 48  ;;  %1541 = vst [vmem:[%s1489_s9 + $0x40] sm:$0xff] (%p1879_p5), %v1540_v39 }
 0x494   : > { %v1454_v57 = vpop.permute.xlu0 %1453 }
 0x495   : > { %v1462_v58 = vsel %vm608_vm1, %v1452_v33, %v1454_v57  ;;  %v1542_v15 = vld [vmem:[%s2537_s20 + $0x28] sm:$0xff] (%p1879_p5) }
 0x496   : > { %1478 = vst [vmem:[%s2537_s20 + $0x38] sm:$0xff] %v1462_v58  ;;  %1543 = vst [vmem:[%s1489_s9 + $0x50] sm:$0xff] (%p1879_p5), %v1542_v15 }
 0x499   : > { %v1544_v16 = vld [vmem:[%s2537_s20 + $0x30] sm:$0xff] }
 0x49a   : > { %1545 = vst [vmem:[%s1489_s9 + $0x60] sm:$0xff] %v1544_v16 }
 0x49d   : > { %v1546_v61 = vld [vmem:[%s2537_s20 + $0x38] sm:$0xff] }
 0x49e   : > { %1547 = vst [vmem:[%s1489_s9 + $0x70] sm:$0xff] %v1546_v61 }
 0x49f PF: > { %s16_s27 = sadd.s32 1, %s1792_s27   ;;  %s2602_s21 = smov %s1772_s22 }
 0x4a0   : > { %p13_p10 = scmp.ge.s32.totalorder %s16_s27, 6   ;;  %s2603_s22 = smov %s1890_s12 }
 0x4a1   : > { %s2604_s23 = smov %s1784_s25  ;;  %s2605_s24 = smov %s1788_s26 }
 0x4a2   : > { %s2606_s25 = smov %s2609_s28  ;;  %s2607_s26 = smov %s2613_s29 }
 0x4a3   :  { %15 = sbr.rel (!%p13_p10) target bundleno = 4 (0x4), region = 113 }

</bundles_post_ra>
